<compile_context>
chip_gen: v5e
topology: v5e:2x2
jax: 0.10.0
libtpu: 0.0.40
codegen_flags: <defaults>
</compile_context>

<pallas_src>
import math

import jax
import jax.numpy as jnp
from jax.experimental import pallas as pl
from jax.experimental.pallas import tpu as pltpu


_VMEM_LIMIT_BYTES = 48 * 1024 * 1024   # <= v7x 64 MiB/TC, << v5e/v6e 128 MiB


def _pick_block_rows(n_pad, d):
    """Largest adj row block whose per-step VMEM estimate fits the budget and
    that still leaves >= 2 grid blocks (megacore sharding on v7x)."""
    def est(br):
        adj_path = br * n_pad * (2 * 1 + 2)           # 2 int8 bufs + bf16 cast temp
        invariants = 2 * n_pad * (d + 1) * 2 + 2 * n_pad * 2 * 2   # xa, vb (dbl buf)
        rows = 2 * br * (4 * d + 4 + 2 * 2 + 4)       # x, partial, vb, score blocks
        return adj_path + invariants + rows
    for br in (512, 256, 128):
        if n_pad % br == 0 and n_pad // br >= 2 and est(br) <= (3 * _VMEM_LIMIT_BYTES) // 4:
            return br
    return 128


# ---------------------------------------------------------------------------
# Pass 1 (per adj row block):
#   agg = adj_blk @ [x | 1]  -> neighbor sums + degree
#   v       = (x - x_mean)^2 . w_std          (per-node projection, [TM,1])
#   partial = x_mean . w_mean + x . w_x       ([TM,1])
#   outputs vb = [v | 1] (bf16) and partial (f32); no [N,D] intermediates.
# ---------------------------------------------------------------------------
def _pass1_kernel(adj_ref, xa_ref, x_ref, w_ref, vb_ref, part_ref):
    d = x_ref.shape[-1]
    adj = adj_ref[...].astype(jnp.bfloat16)           # int8 -> bf16 in VMEM
    agg = jnp.dot(adj, xa_ref[...], preferred_element_type=jnp.float32)  # [TM, D+1]
    deg = agg[:, d:d + 1]
    # degree 0 -> mean 0 (matches torch_sparse scatter_mean semantics)
    deg_inv = jnp.where(deg > 0.0, 1.0 / jnp.maximum(deg, 1.0), 0.0)

    x = x_ref[...]                                     # [TM, D] f32
    x_mean = agg[:, :d] * deg_inv                      # [TM, D] f32
    diff = x - x_mean

    w_mean = w_ref[0:1, :]                             # [1, D] each
    w_std = w_ref[1:2, :]
    w_x = w_ref[2:3, :]

    v = jnp.sum(diff * diff * w_std, axis=-1, keepdims=True)              # [TM, 1]
    partial = jnp.sum(x_mean * w_mean + x * w_x, axis=-1, keepdims=True)  # [TM, 1]

    # vb = [v | 1]: column of ones lets pass 2 recompute the degree on the MXU.
    lane = jax.lax.broadcasted_iota(jnp.int32, (v.shape[0], 2), dimension=1)
    vb = jnp.where(lane == 0, v, 1.0)                  # [TM, 2]
    vb_ref[...] = vb.astype(jnp.bfloat16)
    part_ref[...] = partial


# ---------------------------------------------------------------------------
# Pass 2 (per adj row block):
#   agg = adj_blk @ [v | 1]  -> (sum_j adj_ij v_j, degree)
#   score = sigmoid(partial + deg_inv * agg[:,0])
# ---------------------------------------------------------------------------
def _pass2_kernel(adj_ref, vb_ref, part_ref, out_ref):
    adj = adj_ref[...].astype(jnp.bfloat16)            # int8 -> bf16 in VMEM
    agg = jnp.dot(adj, vb_ref[...], preferred_element_type=jnp.float32)   # [TM, 2]
    sv = agg[:, 0:1]
    deg = agg[:, 1:2]
    deg_inv = jnp.where(deg > 0.0, 1.0 / jnp.maximum(deg, 1.0), 0.0)
    out_ref[...] = jax.nn.sigmoid(part_ref[...] + deg_inv * sv)


# ---------------------------------------------------------------------------
# Wrapper
# ---------------------------------------------------------------------------
def weight_score_layer(x, adj, w, *, block_rows=None):
    n, d = x.shape
    assert adj.shape == (n, n)
    assert w.shape == (3 * d, 1)

    # Keep adj persistently int8 (exact for 0/1); this cast only fires if the
    # caller hands us something else — hoist it out of the hot path.
    if adj.dtype != jnp.int8:
        adj = adj.astype(jnp.int8)
    x = x.astype(jnp.float32)
    w = w.astype(jnp.float32)

    # Pad N to a multiple of 128 (pad rows/cols are zero -> degree 0).
    n_pad = int(pl.cdiv(n, 128)) * 128
    if n_pad != n:
        adj = jnp.pad(adj, ((0, n_pad - n), (0, n_pad - n)))
        x_p = jnp.pad(x, ((0, n_pad - n), (0, 0)))
    else:
        x_p = x

    if block_rows is None:
        block_rows = _pick_block_rows(n_pad, d)
    assert n_pad % block_rows == 0 and block_rows % 8 == 0
    grid = (n_pad // block_rows,)

    # [x | 1] in bf16: the ones column folds the degree reduction into the MXU.
    xa_bf16 = jnp.concatenate(
        [x_p.astype(jnp.bfloat16), jnp.ones((n_pad, 1), jnp.bfloat16)], axis=-1)
    # PyTorch Linear weight column [3D, 1] -> rows [w_mean; w_std; w_x].
    w3 = w[:, 0].reshape(3, d)

    cparams = pltpu.CompilerParams(
        dimension_semantics=("parallel",),
        vmem_limit_bytes=_VMEM_LIMIT_BYTES)

    # ---- pass 1: per-node v and partial ------------------------------------
    vb, partial = pl.pallas_call(
        _pass1_kernel,
        out_shape=(
            jax.ShapeDtypeStruct((n_pad, 2), jnp.bfloat16),
            jax.ShapeDtypeStruct((n_pad, 1), jnp.float32),
        ),
        grid=grid,
        in_specs=[
            pl.BlockSpec((block_rows, n_pad), lambda i: (i, 0)),   # adj rows (int8)
            pl.BlockSpec((n_pad, d + 1), lambda i: (0, 0)),        # [x | 1] (invariant)
            pl.BlockSpec((block_rows, d), lambda i: (i, 0)),       # x rows (f32)
            pl.BlockSpec((3, d), lambda i: (0, 0)),                # weights (invariant)
        ],
        out_specs=(
            pl.BlockSpec((block_rows, 2), lambda i: (i, 0)),
            pl.BlockSpec((block_rows, 1), lambda i: (i, 0)),
        ),
        compiler_params=cparams,
    )(adj, xa_bf16, x_p, w3)

    # ---- pass 2: aggregate v, rebuild degree, add partial, sigmoid ---------
    score = pl.pallas_call(
        _pass2_kernel,
        out_shape=jax.ShapeDtypeStruct((n_pad, 1), jnp.float32),
        grid=grid,
        in_specs=[
            pl.BlockSpec((block_rows, n_pad), lambda i: (i, 0)),   # adj rows (int8)
            pl.BlockSpec((n_pad, 2), lambda i: (0, 0)),            # [v | 1] (invariant)
            pl.BlockSpec((block_rows, 1), lambda i: (i, 0)),       # partial rows
        ],
        out_specs=pl.BlockSpec((block_rows, 1), lambda i: (i, 0)),
        compiler_params=cparams,
    )(adj, vb, partial)

    return score[:n]


# ---------------------------------------------------------------------------
# Pure-JAX f32 reference (HIGHEST precision matmuls)
# ---------------------------------------------------------------------------
def reference(x, adj, w):
    hp = jax.lax.Precision.HIGHEST
    adj = adj.astype(jnp.float32)
    deg = jnp.sum(adj, axis=-1, keepdims=True)
    deg_inv = jnp.where(deg > 0.0, 1.0 / jnp.maximum(deg, 1.0), 0.0)
    x_mean = jnp.dot(adj, x, precision=hp) * deg_inv
    x_std = jnp.dot(adj, (x - x_mean) ** 2, precision=hp) * deg_inv
    feats = jnp.concatenate([x_mean, x_std, x], axis=-1)
    return jax.nn.sigmoid(jnp.dot(feats, w, precision=hp))


if __name__ == "__main__":
    N = 200            # not a multiple of 128 -> exercises padding + 2-block grid
    D = 32             # embedding_size

    key = jax.random.PRNGKey(0)
    kx, kadj, kw = jax.random.split(key, 3)

    x = jax.random.normal(kx, (N, D), dtype=jnp.float32)
    # dense 0/1 adjacency, stored persistently as int8 (1 B/elem, exact)
    adj = (jax.random.uniform(kadj, (N, N)) < 0.1).astype(jnp.int8)

    # nn.Linear(3*D, 1, bias=False) default init: U(-1/sqrt(fan_in), 1/sqrt(fan_in))
    bound = 1.0 / math.sqrt(3 * D)
    w = jax.random.uniform(kw, (3 * D, 1), minval=-bound, maxval=bound,
                           dtype=jnp.float32)

    score = jax.jit(weight_score_layer)(x, adj, w)
    jax.block_until_ready(score)

    ref = reference(x, adj, w)
    assert score.shape == (N, 1), score.shape
    # bf16 MXU operands (adj exact, x / v rounded) vs f32 reference: ~1e-3
    # post-sigmoid; 1e-2 tolerance has ample margin.
    max_err = float(jnp.max(jnp.abs(score - ref)))
    assert max_err < 1e-2, f"max abs err {max_err}"

    print("KERNEL_OK")
</pallas_src>

<mosaic_0001>
module attributes {stable_mosaic.version = 11 : i64} {
  func.func @_pass2_kernel(%arg0: i32, %arg1: memref<128x256xi8, #tpu.memory_space<vmem>>, %arg2: memref<256x2xbf16, #tpu.memory_space<vmem>>, %arg3: memref<128x1xf32, #tpu.memory_space<vmem>>, %arg4: memref<128x1xf32, #tpu.memory_space<vmem>>) attributes {dimension_semantics = [#tpu.dimension_semantics<parallel>], iteration_bounds = array<i64: 2>, scalar_prefetch = 0 : i64, scratch_operands = 0 : i64, tpu.core_type = #tpu.core_type<tc>, window_params = [{transform_indices = @transform_0, window_bounds = array<i64: 128, 256>}, {pipeline_mode = #tpu.pipeline_mode<synchronous>, transform_indices = @transform_1, window_bounds = array<i64: 256, 2>}, {transform_indices = @transform_2, window_bounds = array<i64: 128, 1>}, {transform_indices = @transform_3, window_bounds = array<i64: 128, 1>}]} {
    %c0 = arith.constant 0 : index
    %c0_0 = arith.constant 0 : index
    %0 = vector.load %arg1[%c0, %c0_0] : memref<128x256xi8, #tpu.memory_space<vmem>>, vector<128x256xi8>
    %1 = arith.sitofp %0 : vector<128x256xi8> to vector<128x256xbf16>
    %c0_1 = arith.constant 0 : index
    %c0_2 = arith.constant 0 : index
    %2 = vector.load %arg2[%c0_1, %c0_2] : memref<256x2xbf16, #tpu.memory_space<vmem>>, vector<256x2xbf16>
    %cst = arith.constant dense<0.000000e+00> : vector<128x2xf32>
    %3 = tpu.matmul %1, %2, %cst {dimension_numbers = #tpu.dot_dimension_numbers<[1], [0], [0], [1], [0, 0, 1, 1], [], []>} : vector<128x256xbf16>, vector<256x2xbf16>, vector<128x2xf32> -> vector<128x2xf32>
    %4 = vector.extract_strided_slice %3 {offsets = [0, 0], sizes = [128, 1], strides = [1, 1]} : vector<128x2xf32> to vector<128x1xf32>
    %5 = vector.extract_strided_slice %3 {offsets = [0, 1], sizes = [128, 1], strides = [1, 1]} : vector<128x2xf32> to vector<128x1xf32>
    %cst_3 = arith.constant 0.000000e+00 : f32
    %6 = vector.broadcast %cst_3 : f32 to vector<128x1xf32>
    %7 = arith.cmpf ogt, %5, %6 : vector<128x1xf32>
    %cst_4 = arith.constant 1.000000e+00 : f32
    %8 = vector.broadcast %cst_4 : f32 to vector<128x1xf32>
    %9 = arith.maximumf %5, %8 : vector<128x1xf32>
    %cst_5 = arith.constant 1.000000e+00 : f32
    %10 = vector.broadcast %cst_5 : f32 to vector<128x1xf32>
    %11 = arith.divf %10, %9 : vector<128x1xf32>
    %cst_6 = arith.constant 0.000000e+00 : f32
    %12 = vector.broadcast %cst_6 : f32 to vector<128x1xf32>
    %13 = arith.select %7, %11, %12 : vector<128x1xi1>, vector<128x1xf32>
    %c0_7 = arith.constant 0 : index
    %c0_8 = arith.constant 0 : index
    %14 = vector.load %arg3[%c0_7, %c0_8] : memref<128x1xf32, #tpu.memory_space<vmem>>, vector<128x1xf32>
    %15 = arith.mulf %13, %4 : vector<128x1xf32>
    %16 = arith.addf %14, %15 : vector<128x1xf32>
    %17 = arith.negf %16 : vector<128x1xf32>
    %18 = math.exp %17 : vector<128x1xf32>
    %cst_9 = arith.constant 1.000000e+00 : f32
    %19 = vector.broadcast %cst_9 : f32 to vector<128x1xf32>
    %20 = arith.addf %19, %18 : vector<128x1xf32>
    %21 = arith.divf %19, %20 : vector<128x1xf32>
    %c0_10 = arith.constant 0 : index
    %c0_11 = arith.constant 0 : index
    %22 = vector.load %arg4[%c0_10, %c0_11] : memref<128x1xf32, #tpu.memory_space<vmem>>, vector<128x1xf32>
    tpu.vector_store %arg4[%c0_10, %c0_11], %21 {strides = array<i32>} : memref<128x1xf32, #tpu.memory_space<vmem>>, vector<128x1xf32>,
    return
  }
  func.func @transform_0(%arg0: i32) -> (i32, i32) {
    %c0_i32 = arith.constant 0 : i32
    %c0_i32_0 = arith.constant 0 : i32
    return %arg0, %c0_i32 : i32, i32
  }
  func.func @transform_1(%arg0: i32) -> (i32, i32) {
    %c0_i32 = arith.constant 0 : i32
    %c0_i32_0 = arith.constant 0 : i32
    %c0_i32_1 = arith.constant 0 : i32
    return %c0_i32, %c0_i32_0 : i32, i32
  }
  func.func @transform_2(%arg0: i32) -> (i32, i32) {
    %c0_i32 = arith.constant 0 : i32
    %c0_i32_0 = arith.constant 0 : i32
    return %arg0, %c0_i32 : i32, i32
  }
  func.func @transform_3(%arg0: i32) -> (i32, i32) {
    %c0_i32 = arith.constant 0 : i32
    %c0_i32_0 = arith.constant 0 : i32
    return %arg0, %c0_i32 : i32, i32
  }
}

module attributes {stable_mosaic.version = 11 : i64} {
  func.func @_pass1_kernel(%arg0: i32, %arg1: memref<128x256xi8, #tpu.memory_space<vmem>>, %arg2: memref<256x33xbf16, #tpu.memory_space<vmem>>, %arg3: memref<128x32xf32, #tpu.memory_space<vmem>>, %arg4: memref<3x32xf32, #tpu.memory_space<vmem>>, %arg5: memref<128x2xbf16, #tpu.memory_space<vmem>>, %arg6: memref<128x1xf32, #tpu.memory_space<vmem>>) attributes {dimension_semantics = [#tpu.dimension_semantics<parallel>], iteration_bounds = array<i64: 2>, scalar_prefetch = 0 : i64, scratch_operands = 0 : i64, tpu.core_type = #tpu.core_type<tc>, window_params = [{transform_indices = @transform_0, window_bounds = array<i64: 128, 256>}, {pipeline_mode = #tpu.pipeline_mode<synchronous>, transform_indices = @transform_1, window_bounds = array<i64: 256, 33>}, {transform_indices = @transform_2, window_bounds = array<i64: 128, 32>}, {pipeline_mode = #tpu.pipeline_mode<synchronous>, transform_indices = @transform_3, window_bounds = array<i64: 3, 32>}, {transform_indices = @transform_4, window_bounds = array<i64: 128, 2>}, {transform_indices = @transform_5, window_bounds = array<i64: 128, 1>}]} {
    %c0 = arith.constant 0 : index
    %c0_0 = arith.constant 0 : index
    %0 = vector.load %arg1[%c0, %c0_0] : memref<128x256xi8, #tpu.memory_space<vmem>>, vector<128x256xi8>
    %1 = arith.sitofp %0 : vector<128x256xi8> to vector<128x256xbf16>
    %c0_1 = arith.constant 0 : index
    %c0_2 = arith.constant 0 : index
    %2 = vector.load %arg2[%c0_1, %c0_2] : memref<256x33xbf16, #tpu.memory_space<vmem>>, vector<256x33xbf16>
    %cst = arith.constant dense<0.000000e+00> : vector<128x33xf32>
    %3 = tpu.matmul %1, %2, %cst {dimension_numbers = #tpu.dot_dimension_numbers<[1], [0], [0], [1], [0, 0, 1, 1], [], []>} : vector<128x256xbf16>, vector<256x33xbf16>, vector<128x33xf32> -> vector<128x33xf32>
    %4 = vector.extract_strided_slice %3 {offsets = [0, 32], sizes = [128, 1], strides = [1, 1]} : vector<128x33xf32> to vector<128x1xf32>
    %cst_3 = arith.constant 0.000000e+00 : f32
    %5 = vector.broadcast %cst_3 : f32 to vector<128x1xf32>
    %6 = arith.cmpf ogt, %4, %5 : vector<128x1xf32>
    %cst_4 = arith.constant 1.000000e+00 : f32
    %7 = vector.broadcast %cst_4 : f32 to vector<128x1xf32>
    %8 = arith.maximumf %4, %7 : vector<128x1xf32>
    %cst_5 = arith.constant 1.000000e+00 : f32
    %9 = vector.broadcast %cst_5 : f32 to vector<128x1xf32>
    %10 = arith.divf %9, %8 : vector<128x1xf32>
    %cst_6 = arith.constant 0.000000e+00 : f32
    %11 = vector.broadcast %cst_6 : f32 to vector<128x1xf32>
    %12 = arith.select %6, %10, %11 : vector<128x1xi1>, vector<128x1xf32>
    %c0_7 = arith.constant 0 : index
    %c0_8 = arith.constant 0 : index
    %13 = vector.load %arg3[%c0_7, %c0_8] : memref<128x32xf32, #tpu.memory_space<vmem>>, vector<128x32xf32>
    %14 = vector.extract_strided_slice %3 {offsets = [0, 0], sizes = [128, 32], strides = [1, 1]} : vector<128x33xf32> to vector<128x32xf32>
    %15 = vector.broadcast %12 : vector<128x1xf32> to vector<128x32xf32>
    %16 = arith.mulf %14, %15 : vector<128x32xf32>
    %17 = arith.subf %13, %16 : vector<128x32xf32>
    %c0_9 = arith.constant 0 : index
    %c0_10 = arith.constant 0 : index
    %18 = vector.load %arg4[%c0_9, %c0_10] : memref<3x32xf32, #tpu.memory_space<vmem>>, vector<1x32xf32>
    %c1 = arith.constant 1 : index
    %c0_11 = arith.constant 0 : index
    %19 = vector.load %arg4[%c1, %c0_11] : memref<3x32xf32, #tpu.memory_space<vmem>>, vector<1x32xf32>
    %c2 = arith.constant 2 : index
    %c0_12 = arith.constant 0 : index
    %20 = vector.load %arg4[%c2, %c0_12] : memref<3x32xf32, #tpu.memory_space<vmem>>, vector<1x32xf32>
    %21 = arith.mulf %17, %17 : vector<128x32xf32>
    %22 = vector.broadcast %19 : vector<1x32xf32> to vector<128x32xf32>
    %23 = arith.mulf %21, %22 : vector<128x32xf32>
    %cst_13 = arith.constant dense<0.000000e+00> : vector<128xf32>
    %24 = vector.multi_reduction <add>, %23, %cst_13 [1] : vector<128x32xf32> to vector<128xf32>
    %25 = vector.shape_cast %24 : vector<128xf32> to vector<128x1xf32>
    %26 = vector.broadcast %18 : vector<1x32xf32> to vector<128x32xf32>
    %27 = arith.mulf %16, %26 : vector<128x32xf32>
    %28 = vector.broadcast %20 : vector<1x32xf32> to vector<128x32xf32>
    %29 = arith.mulf %13, %28 : vector<128x32xf32>
    %30 = arith.addf %27, %29 : vector<128x32xf32>
    %cst_14 = arith.constant dense<0.000000e+00> : vector<128xf32>
    %31 = vector.multi_reduction <add>, %30, %cst_14 [1] : vector<128x32xf32> to vector<128xf32>
    %32 = vector.shape_cast %31 : vector<128xf32> to vector<128x1xf32>
    %33 = tpu.iota {dimensions = array<i32: 1>} : vector<128x2xi32>
    %c0_i32 = arith.constant 0 : i32
    %34 = vector.broadcast %c0_i32 : i32 to vector<128x2xi32>
    %35 = arith.cmpi eq, %33, %34 : vector<128x2xi32>
    %cst_15 = arith.constant 1.000000e+00 : f32
    %36 = vector.shape_cast %25 : vector<128x1xf32> to vector<128x1xf32>
    %37 = vector.broadcast %36 : vector<128x1xf32> to vector<128x2xf32>
    %38 = vector.broadcast %cst_15 : f32 to vector<128x2xf32>
    %39 = arith.select %35, %37, %38 : vector<128x2xi1>, vector<128x2xf32>
    %40 = arith.truncf %39 : vector<128x2xf32> to vector<128x2xbf16>
    %c0_16 = arith.constant 0 : index
    %c0_17 = arith.constant 0 : index
    %41 = vector.load %arg5[%c0_16, %c0_17] : memref<128x2xbf16, #tpu.memory_space<vmem>>, vector<128x2xbf16>
    tpu.vector_store %arg5[%c0_16, %c0_17], %40 {strides = array<i32>} : memref<128x2xbf16, #tpu.memory_space<vmem>>, vector<128x2xbf16>,
    %c0_18 = arith.constant 0 : index
    %c0_19 = arith.constant 0 : index
    %42 = vector.load %arg6[%c0_18, %c0_19] : memref<128x1xf32, #tpu.memory_space<vmem>>, vector<128x1xf32>
    tpu.vector_store %arg6[%c0_18, %c0_19], %32 {strides = array<i32>} : memref<128x1xf32, #tpu.memory_space<vmem>>, vector<128x1xf32>,
    return
  }
  func.func @transform_0(%arg0: i32) -> (i32, i32) {
    %c0_i32 = arith.constant 0 : i32
    %c0_i32_0 = arith.constant 0 : i32
    return %arg0, %c0_i32 : i32, i32
  }
  func.func @transform_1(%arg0: i32) -> (i32, i32) {
    %c0_i32 = arith.constant 0 : i32
    %c0_i32_0 = arith.constant 0 : i32
    %c0_i32_1 = arith.constant 0 : i32
    return %c0_i32, %c0_i32_0 : i32, i32
  }
  func.func @transform_2(%arg0: i32) -> (i32, i32) {
    %c0_i32 = arith.constant 0 : i32
    %c0_i32_0 = arith.constant 0 : i32
    return %arg0, %c0_i32 : i32, i32
  }
  func.func @transform_3(%arg0: i32) -> (i32, i32) {
    %c0_i32 = arith.constant 0 : i32
    %c0_i32_0 = arith.constant 0 : i32
    %c0_i32_1 = arith.constant 0 : i32
    return %c0_i32, %c0_i32_0 : i32, i32
  }
  func.func @transform_4(%arg0: i32) -> (i32, i32) {
    %c0_i32 = arith.constant 0 : i32
    %c0_i32_0 = arith.constant 0 : i32
    return %arg0, %c0_i32 : i32, i32
  }
  func.func @transform_5(%arg0: i32) -> (i32, i32) {
    %c0_i32 = arith.constant 0 : i32
    %c0_i32_0 = arith.constant 0 : i32
    return %arg0, %c0_i32 : i32, i32
  }
}

</mosaic_0001>

<bundles_post_ra>
// kernel: squeeze.1
= control target key start
LH: loop header
LB: loop body
LE: loop exit
PB: predicated region body
PF: predicated region fallthrough
CT: control target
= control target key end

     0   :  { %s30_s8 = smov 64   ;;  %vm7_vm0 = vcmask 261120   ;;  %s47_s0 = inlined_call_operand.vmem [shape: f32[96], index: 0, kind: input, shape index: {}]   ;;  %s48_s1 = inlined_call_operand.vmem [shape: f32[3,32], index: 1, kind: output, shape index: {}]  }
   0x1   :  { %v4_v0 = vld [vmem:[%s47_s0] sm:$0x1]  ;;  %s29_s0 = smov 96  }
   0x2   :  { %5 = vst [vmem:[#allocation1] sm:$0x1] %v4_v0 }
   0x9   :  { %v9_v1 = vld [vmem:[#allocation1] sm:$0x1]  }
   0xa   :  { %10 = vrot.lane.b32.xlu0 %v9_v1, %s29_s0  ;;  %v15_v2 = vld [vmem:[#allocation1] sm:$0x1]  }
   0xb   :  { %v6_v3 = vld [vmem:[#allocation1] sm:$0x1]  }
   0xc   :  { %8 = vst.msk [vmem:[#allocation0] sm:$0x1] %vm7_vm0, %v6_v3  }
  0x12   :  { %16 = vrot.lane.b32.xlu0 %v15_v2, %s30_s8 }
  0x7c   :  { %v11_v4 = vpop.permute.xlu0 %10  }
  0x7d   :  { %14 = vst.msk [vmem:[#allocation0 + $0x1] sm:$0x1] %vm7_vm0, %v11_v4  }
  0x84   :  { %v17_v5 = vpop.permute.xlu0 %16  }
  0x85   :  { %20 = vst.msk [vmem:[#allocation0 + $0x2] sm:$0x1] %vm7_vm0, %v17_v5  }
  0x8c   :  { %v23_v6 = vld [vmem:[#allocation0] sm:$0xf] }
  0x8d   :  { %26 = vst [vmem:[%s48_s1] sm:$0xf] %v23_v6 }

// kernel: weight_score_layer.3
= control target key start
LH: loop header
LB: loop body
LE: loop exit
PB: predicated region body
PF: predicated region fallthrough
CT: control target
= control target key end

     0   :  { %s1629_s12 = smov 0   ;;  %s2306_s0 = inlined_call_operand.vmem [shape: s8[256,256], index: 0, kind: input, shape index: {}]   ;;  %s2307_s1 = inlined_call_operand.vmem [shape: bf16[256,2], index: 1, kind: input, shape index: {}]   ;;  %s2308_s2 = inlined_call_operand.vmem [shape: f32[256,1], index: 2, kind: input, shape index: {}]   ;;  %s2309_s3 = inlined_call_operand.vmem [shape: f32[256,1], index: 3, kind: output, shape index: {}]  }
   0x1 LB: > { %s1366_s13 = sadd.s32 4294967295, %s1605_s12   ;;  %p1370_p0 = scmp.ge.s32.totalorder %s1605_s12, 1  ;;  %s1605_s12 = sphi %s1629_s12, %s13_s12  }
   0x2   : > { %p150_p1 = scmp.lt.s32.totalorder %s1605_s12, 3 }
   0x4   : > { %p151_p2 = pnand %p1370_p0, %p150_p1 }
   0x5   : > { %s1371_s18 = sshll.u32 (!%p151_p2), %s1366_s13, 2  ;;  %s1607_s26 = smov (!%p151_p2), 1  }
   0x6   : > { %154 = sbr.rel (%p151_p2) target bundleno = 497 (0x1f1), region = 32  ;;  %p181_p3 = scmp.lt.s32.totalorder (!%p151_p2), %s1371_s18, 7 }
   0x7   : > { %s1608_s27 = smov (!%p151_p2), 127   ;;  %s1374_s28 = sshll.u32 (!%p151_p2), %s1366_s13, 4 }
   0x8   : > { %p188_p4 = scmp.lt.s32.totalorder (!%p151_p2), %s1374_s28, 31 }
   0xb   : > { %v1468_v0 = vld [vmem:[%s2307_s1 + $0x38] sm:$0xff]  ;;  %v1467_v2 = vld [vmem:[%s2307_s1 + $0x30] sm:$0xff]  ;;  %v1466_v4 = vld [vmem:[%s2307_s1 + $0x28] sm:$0xff]  ;;  %s2343_s18 = smov (!%p181_p3, %s1371_s18), 7  ;;  %s2345_s28 = smov (!%p188_p4, %s1374_s28), 31 }
   0xc   : > { %v1476_v1 = vld [vmem:[%s2307_s1 + $0x78] sm:$0xff]  ;;  %415 = vmatpush.bf16.msra.mxu0 %v1468_v0  ;;  %1477 = vmatpush.bf16.msra.mxu2 %v1468_v0  ;;  %v1475_v3 = vld [vmem:[%s2307_s1 + $0x70] sm:$0xff]  ;;  %v1474_v5 = vld [vmem:[%s2307_s1 + $0x68] sm:$0xff]  ;;  %s1460_s4 = sshll.u32 %s2343_s18, 4  ;;  %s1375_s29 = sshll.u32 %s2345_s28, 3 }
   0xd   : > { %464 = vmatpush.bf16.msra.mxu1 %v1476_v1  ;;  %1485 = vmatpush.bf16.msra.mxu3 %v1476_v1  ;;  %v1465_v6 = vld [vmem:[%s2307_s1 + $0x20] sm:$0xff]  ;;  %v1464_v8 = vld [vmem:[%s2307_s1 + $0x18] sm:$0xff]  ;;  %s1672_s11 = scalar_lea.vmem %s2306_s0, %s1460_s4  ;;  %v1463_v10 = vld [vmem:[%s2307_s1 + $0x10] sm:$0xff]  ;;  %s2134_s5 = scalar_lea.vmem %s2308_s2, %s1375_s29 }
   0xe   : > { %v1473_v7 = vld [vmem:[%s2307_s1 + $0x60] sm:$0xff]  ;;  %v1472_v9 = vld [vmem:[%s2307_s1 + $0x58] sm:$0xff]  ;;  %v1471_v13 = vld [vmem:[%s2307_s1 + $0x50] sm:$0xff]  ;;  %s2146_s7 = scalar_lea.vmem %s2309_s3, %s1375_s29 }
   0xf   : > { %v199_v11 = vld [vmem:[%s1672_s11] sm:$0xff]  ;;  %v200_v14 = vld [vmem:[%s1672_s11 + $0x8] sm:$0xff]  ;;  %v201_v60 = vld [vmem:[%s1672_s11 + $0x10] sm:$0xff] }
  0x10   : > { %416 = vmatpush.bf16.msra.mxu0 %v1467_v2  ;;  %1478 = vmatpush.bf16.msra.mxu2 %v1467_v2  ;;  %v203_v12 = vld [vmem:[%s1672_s11 + $0x20] sm:$0xff]  ;;  %v204_v15 = vld [vmem:[%s1672_s11 + $0x28] sm:$0xff]  ;;  %v207_v16 = vunpack.c.0.s8 %v199_v11  ;;  %v209_v17 = vunpack.c.1.s8 %v199_v11  ;;  %v208_v21 = vunpack.c.0.s8 %v200_v14  ;;  %v210_v22 = vunpack.c.1.s8 %v200_v14  ;;  %v205_v61 = vld [vmem:[%s1672_s11 + $0x30] sm:$0xff] }
  0x11   : > { %465 = vmatpush.bf16.msra.mxu1 %v1475_v3  ;;  %1486 = vmatpush.bf16.msra.mxu3 %v1475_v3  ;;  %v223_v18 = vunpack.c.0.s8 %v203_v12  ;;  %v225_v19 = vunpack.c.1.s8 %v203_v12  ;;  %v1462_v20 = vld [vmem:[%s2307_s1 + $0x8] sm:$0xff]  ;;  %v224_v23 = vunpack.c.0.s8 %v204_v15  ;;  %v226_v24 = vunpack.c.1.s8 %v204_v15  ;;  %v1461_v30 = vld [vmem:[%s2307_s1] sm:$0xff]  ;;  %v202_v62 = vld [vmem:[%s1672_s11 + $0x18] sm:$0xff] }
  0x12   : > { %v1470_v25 = vld [vmem:[%s2307_s1 + $0x48] sm:$0xff]  ;;  %v239_v26 = vcvt.s32.f32 %v207_v16  ;;  %v241_v27 = vcvt.s32.f32 %v209_v17  ;;  %v240_v31 = vcvt.s32.f32 %v208_v21  ;;  %v242_v32 = vcvt.s32.f32 %v210_v22  ;;  %v1469_v35 = vld [vmem:[%s2307_s1 + $0x40] sm:$0xff]  ;;  %v206_v63 = vld [vmem:[%s1672_s11 + $0x38] sm:$0xff] }
  0x13   : > { %v255_v28 = vcvt.s32.f32 %v223_v18  ;;  %v257_v29 = vcvt.s32.f32 %v225_v19  ;;  %v256_v33 = vcvt.s32.f32 %v224_v23  ;;  %v258_v34 = vcvt.s32.f32 %v226_v24 }
  0x14   : > { %417 = vmatpush.bf16.msra.mxu0 %v1466_v4  ;;  %1479 = vmatpush.bf16.msra.mxu2 %v1466_v4  ;;  %v271_v36 = vpack.c.bf16 %v241_v27, %v239_v26  ;;  %v272_v38 = vpack.c.bf16 %v242_v32, %v240_v31  ;;  %v211_v40 = vunpack.c.2.s8 %v199_v11  ;;  %v213_v41 = vunpack.c.3.s8 %v199_v11 }
  0x15   : > { %466 = vmatpush.bf16.msra.mxu1 %v1474_v5  ;;  %1487 = vmatpush.bf16.msra.mxu3 %v1474_v5  ;;  %v279_v37 = vpack.c.bf16 %v257_v29, %v255_v28  ;;  %v280_v39 = vpack.c.bf16 %v258_v34, %v256_v33  ;;  %v227_v42 = vunpack.c.2.s8 %v203_v12  ;;  %v229_v43 = vunpack.c.3.s8 %v203_v12 }
  0x16   : > { %v212_v44 = vunpack.c.2.s8 %v200_v14  ;;  %v214_v45 = vunpack.c.3.s8 %v200_v14  ;;  %v228_v46 = vunpack.c.2.s8 %v204_v15  ;;  %v230_v47 = vunpack.c.3.s8 %v204_v15 }
  0x17   : > { %v243_v48 = vcvt.s32.f32 %v211_v40  ;;  %v245_v49 = vcvt.s32.f32 %v213_v41  ;;  %v259_v50 = vcvt.s32.f32 %v227_v42  ;;  %v261_v51 = vcvt.s32.f32 %v229_v43 }
  0x18   : > { %418 = vmatpush.bf16.msra.mxu0 %v1465_v6  ;;  %1480 = vmatpush.bf16.msra.mxu2 %v1465_v6  ;;  %v244_v52 = vcvt.s32.f32 %v212_v44  ;;  %v246_v53 = vcvt.s32.f32 %v214_v45  ;;  %v260_v54 = vcvt.s32.f32 %v228_v46  ;;  %v262_v55 = vcvt.s32.f32 %v230_v47 }
  0x19   : > { %467 = vmatpush.bf16.msra.mxu1 %v1473_v7  ;;  %1488 = vmatpush.bf16.msra.mxu3 %v1473_v7  ;;  %v273_v56 = vpack.c.bf16 %v245_v49, %v243_v48  ;;  %v281_v57 = vpack.c.bf16 %v261_v51, %v259_v50  ;;  %v215_v0 = vunpack.c.0.s8 %v201_v60  ;;  %v217_v1 = vunpack.c.1.s8 %v201_v60 }
  0x1a   : > { %v274_v58 = vpack.c.bf16 %v246_v53, %v244_v52  ;;  %v282_v59 = vpack.c.bf16 %v262_v55, %v260_v54  ;;  %v231_v2 = vunpack.c.0.s8 %v205_v61  ;;  %v233_v3 = vunpack.c.1.s8 %v205_v61 }
  0x1b   : > { %v216_v4 = vunpack.c.0.s8 %v202_v62  ;;  %v218_v5 = vunpack.c.1.s8 %v202_v62  ;;  %v232_v6 = vunpack.c.0.s8 %v206_v63  ;;  %v234_v7 = vunpack.c.1.s8 %v206_v63 }
  0x1c   : > { %419 = vmatpush.bf16.msra.mxu0 %v1464_v8  ;;  %1481 = vmatpush.bf16.msra.mxu2 %v1464_v8  ;;  %v247_v8 = vcvt.s32.f32 %v215_v0  ;;  %v265_v11 = vcvt.s32.f32 %v233_v3  ;;  %v221_v21 = vunpack.c.3.s8 %v201_v60  ;;  %v235_v22 = vunpack.c.2.s8 %v205_v61 }
  0x1d   : > { %468 = vmatpush.bf16.msra.mxu1 %v1472_v9  ;;  %1489 = vmatpush.bf16.msra.mxu3 %v1472_v9  ;;  %v249_v9 = vcvt.s32.f32 %v217_v1  ;;  %v248_v12 = vcvt.s32.f32 %v216_v4  ;;  %v264_v14 = vcvt.s32.f32 %v232_v6  ;;  %v266_v15 = vcvt.s32.f32 %v234_v7 }
  0x1e   : > { %v237_v23 = vunpack.c.3.s8 %v205_v61  ;;  %v220_v24 = vunpack.c.2.s8 %v202_v62  ;;  %v236_v26 = vunpack.c.2.s8 %v206_v63  ;;  %v238_v27 = vunpack.c.3.s8 %v206_v63 }
  0x1f   : > { %v275_v16 = vpack.c.bf16 %v249_v9, %v247_v8  ;;  %v284_v19 = vpack.c.bf16 %v266_v15, %v264_v14  ;;  %v253_v29 = vcvt.s32.f32 %v221_v21 }
  0x20   : > { %420 = vmatpush.bf16.msra.mxu0 %v1463_v10  ;;  %1482 = vmatpush.bf16.msra.mxu2 %v1463_v10  ;;  %v263_v10 = vcvt.s32.f32 %v231_v2  ;;  %v269_v31 = vcvt.s32.f32 %v237_v23  ;;  %v252_v32 = vcvt.s32.f32 %v220_v24  ;;  %v268_v34 = vcvt.s32.f32 %v236_v26 }
  0x21   : > { %469 = vmatpush.bf16.msra.mxu1 %v1471_v13  ;;  %1490 = vmatpush.bf16.msra.mxu3 %v1471_v13  ;;  %v250_v13 = vcvt.s32.f32 %v218_v5 }
  0x22   : > { %v283_v17 = vpack.c.bf16 %v265_v11, %v263_v10 }
  0x23   : > { %v276_v18 = vpack.c.bf16 %v250_v13, %v248_v12 }
  0x24   : > { %421 = vmatpush.bf16.msra.mxu0 %v1462_v20  ;;  %1483 = vmatpush.bf16.msra.mxu2 %v1462_v20  ;;  %v219_v20 = vunpack.c.2.s8 %v201_v60 }
  0x25   : > { %470 = vmatpush.bf16.msra.mxu1 %v1470_v25  ;;  %1491 = vmatpush.bf16.msra.mxu3 %v1470_v25  ;;  %v222_v25 = vunpack.c.3.s8 %v202_v62 }
  0x26   : > { %v251_v28 = vcvt.s32.f32 %v219_v20 }
  0x27   : > { %v254_v33 = vcvt.s32.f32 %v222_v25 }
  0x28   : > { %422 = vmatpush.bf16.msra.mxu0 %v1461_v30  ;;  %1484 = vmatpush.bf16.msra.mxu2 %v1461_v30  ;;  %v267_v30 = vcvt.s32.f32 %v235_v22 }
  0x29   : > { %471 = vmatpush.bf16.msra.mxu1 %v1469_v35  ;;  %1492 = vmatpush.bf16.msra.mxu3 %v1469_v35  ;;  %v270_v35 = vcvt.s32.f32 %v238_v27 }
  0x2b   : > { %423 = vmatmul.bf16.vlgmr.msra.gmra.mxu0 %v271_v36  ;;  %443 = vmatmul.bf16.vlgmr.msra.gmra.mxu2 %v279_v37  ;;  %v277_v36 = vpack.c.bf16 %v253_v29, %v251_v28  ;;  %v285_v37 = vpack.c.bf16 %v269_v31, %v267_v30 }
  0x2c   : > { %472 = vmatmul.bf16.vlgmr.msra.gmra.mxu1 %v272_v38  ;;  %492 = vmatmul.bf16.vlgmr.msra.gmra.mxu3 %v280_v39  ;;  %v278_v38 = vpack.c.bf16 %v254_v33, %v252_v32  ;;  %v286_v39 = vpack.c.bf16 %v270_v35, %v268_v34 }
  0x3b   : > { %428 = vmatmul.bf16.gmra.mxu0 %v273_v56  ;;  %448 = vmatmul.bf16.gmra.mxu2 %v281_v57 }
  0x3c   : > { %477 = vmatmul.bf16.gmra.mxu1 %v274_v58  ;;  %497 = vmatmul.bf16.gmra.mxu3 %v282_v59 }
  0x4b   : > { %433 = vmatmul.bf16.gmra.mxu0 %v275_v16  ;;  %453 = vmatmul.bf16.gmra.mxu2 %v283_v17 }
  0x4c   : > { %482 = vmatmul.bf16.gmra.mxu1 %v276_v18  ;;  %502 = vmatmul.bf16.gmra.mxu3 %v284_v19 }
  0x5b   : > { %438 = vmatmul.bf16.gmra.mxu0 %v277_v36  ;;  %458 = vmatmul.bf16.gmra.mxu2 %v285_v37 }
  0x5c   : > { %487 = vmatmul.bf16.gmra.mxu1 %v278_v38  ;;  %507 = vmatmul.bf16.gmra.mxu3 %v286_v39 }
  0xa8   : > { %v424_v40 = vpop.f32.mrf.mxu0 }
  0xa9   : > { %v473_v41 = vpop.f32.mrf.mxu1 }
  0xaa   : > { %v1700_v42 = vadd.f32 %v473_v41, %v424_v40 }
  0xac   : > { %833 = vrot.lane.b32.xlu0 %v1700_v42, %s1607_s26  ;;  %v529_v27 = vmax.f32 %v1700_v42, 1.0  ;;  %vm513_vm10 = vcmp.gt.f32.partialorder %v1700_v42, 0.0 }
  0xae   : > { %v444_v43 = vpop.f32.mrf.mxu2  ;;  %vm550_vm5 = vweird.f32 %v529_v27 }
  0xaf   : > { %v493_v44 = vpop.f32.mrf.mxu3 }
  0xb0   : > { %v1704_v45 = vadd.f32 %v493_v44, %v444_v43  ;;  %v426_v46 = vpop.f32.mrf.mxu0 }
  0xb1   : > { %v475_v47 = vpop.f32.mrf.mxu1 }
  0xb2   : > { %v1706_v48 = vadd.f32 %v475_v47, %v426_v46  ;;  %849 = vrot.lane.b32.xlu2 %v1704_v45, %s1607_s26  ;;  %v537_v24 = vmax.f32 %v1704_v45, 1.0  ;;  %vm521_vm4 = vcmp.gt.f32.partialorder %v1704_v45, 0.0 }
  0xb4   : > { %835 = vrot.lane.b32.xlu0 %v1706_v48, %s1607_s26  ;;  %1503 = vrcp.f32 %v537_v24  ;;  %v1767_v30 = vmax.f32 %v1706_v48, 1.0  ;;  %v676_v32 = vand.u32 2147483648, %v537_v24  ;;  %vm670_vm1 = vweird.f32 %v537_v24 }
  0xb5   : > { %1505 = vrcp.f32 %v529_v27  ;;  %v674_v34 = vand.u32 2147483647, %v537_v24  ;;  %vm514_vm13 = vcmp.gt.f32.partialorder %v1706_v48, 0.0 }
  0xb6   : > { %v446_v49 = vpop.f32.mrf.mxu2  ;;  %1507 = vrcp.f32 %v1767_v30  ;;  %v677_v36 = vor.u32 1.1754944e-38, %v676_v32  ;;  %vm565_vm11 = vweird.f32 %v1767_v30 }
  0xb7   : > { %v495_v50 = vpop.f32.mrf.mxu3  ;;  %vm675_vm3 = vcmp.eq.f32.partialorder %v674_v34, 8.507059e+37 }
  0xb8   : > { %v429_v51 = vpop.f32.mrf.mxu0  ;;  %v1712_v53 = vadd.f32 %v495_v50, %v446_v49 }
  0xb9   : > { %v478_v52 = vpop.f32.mrf.mxu1 }
  0xba   : > { %v1714_v54 = vadd.f32 %v478_v52, %v429_v51  ;;  %v1504_v25 = vpop.eup %1503  ;;  %v1771_v38 = vmax.f32 %v1712_v53, 1.0 }
  0xbb   : > { %v666_v26 = vmul.f32 %v1504_v25, %v537_v24  ;;  %vm671_vm0 = vweird.f32 %v1504_v25  ;;  %v1506_v33 = vpop.eup %1505 }
  0xbc   : > { %851 = vrot.lane.b32.xlu0 %v1712_v53, %s1607_s26  ;;  %837 = vrot.lane.b32.xlu1 %v1714_v54, %s1607_s26  ;;  %vm672_vm2 = vmor %vm670_vm1, %vm671_vm0  ;;  %v546_v37 = vmul.f32 %v1506_v33, %v529_v27  ;;  %v1774_v40 = vmax.f32 %v1714_v54, 1.0  ;;  %v1776_v41 = vpop.eup %1507  ;;  %1509 = vrcp.f32 %v1771_v38  ;;  %vm551_vm6 = vweird.f32 %v1506_v33 }
  0xbd   : > { %v667_v28 = vsub.f32 1.0, %v666_v26  ;;  %v561_v49 = vmul.f32 %v1776_v41, %v1767_v30  ;;  %vm552_vm7 = vmor %vm550_vm5, %vm551_vm6  ;;  %vm566_vm9 = vweird.f32 %v1776_v41  ;;  %vm685_vm15 = vweird.f32 %v1771_v38 }
  0xbe   : > { %v449_v55 = vpop.f32.mrf.mxu2  ;;  %v547_v43 = vsub.f32 1.0, %v546_v37  ;;  %1511 = vrcp.f32 %v1774_v40  ;;  %vm1821_vm12 = vmor %vm565_vm11, %vm566_vm9  ;;  %vm515_vm5 = vcmp.gt.f32.partialorder %v1714_v54, 0.0 }
  0xbf   : > { %v498_v56 = vpop.f32.mrf.mxu3  ;;  %v668_v29 = vmul.f32 %v1504_v25, %v667_v28  ;;  %v562_v52 = vsub.f32 1.0, %v561_v49 }
  0xc0   : > { %v431_v57 = vpop.f32.mrf.mxu0  ;;  %v1720_v59 = vadd.f32 %v498_v56, %v449_v55  ;;  %v548_v50 = vmul.f32 %v1506_v33, %v547_v43 }
  0xc1   : > { %v480_v58 = vpop.f32.mrf.mxu1  ;;  %v669_v31 = vadd.f32 %v1504_v25, %v668_v29 }
  0xc2   : > { %v1726_v1 = vadd.f32 %v480_v58, %v431_v57  ;;  %v1785_v51 = vmax.f32 %v1720_v59, 1.0  ;;  %v1787_v45 = vpop.eup %1509  ;;  %v549_v56 = vadd.f32 %v1506_v33, %v548_v50  ;;  %v556_v58 = vand.u32 2147483648, %v529_v27 }
  0xc3   : > { %v673_v35 = vsel %vm672_vm2, %v1504_v25, %v669_v31  ;;  %v689_v25 = vand.u32 2147483647, %v1771_v38  ;;  %vm686_vm0 = vweird.f32 %v1787_v45  ;;  %vm580_vm2 = vweird.f32 %v1774_v40 }
  0xc4   : > { %853 = vrot.lane.b32.xlu1 %v1720_v59, %s1607_s26  ;;  %v678_v39 = vsel %vm675_vm3, %v677_v36, %v673_v35  ;;  %v1792_v57 = vpop.eup %1511  ;;  %1513 = vrcp.f32 %v1785_v51  ;;  %v691_v36 = vand.u32 2147483648, %v1771_v38  ;;  %v584_v50 = vand.u32 2147483647, %v1774_v40  ;;  %vm1874_vm6 = vmor %vm685_vm15, %vm686_vm0 }
  0xc5   : > { %v793_v46 = vsel %vm521_vm4, %v678_v39, 0.0  ;;  %vm1843_vm1 = vcmp.eq.f32.partialorder %v689_v25, 8.507059e+37  ;;  %vm581_vm3 = vweird.f32 %v1792_v57  ;;  %vm522_vm4 = vcmp.gt.f32.partialorder %v1712_v53, 0.0 }
  0xc6   : > { %v451_v60 = vpop.f32.mrf.mxu2  ;;  %vm700_vm9 = vweird.f32 %v1785_v51  ;;  %vm523_vm0 = vcmp.gt.f32.partialorder %v1720_v59, 0.0 }
  0xc7   : > { %v500_v61 = vpop.f32.mrf.mxu3 }
  0xc8   : > { %v1724_v62 = vadd.f32 %v500_v61, %v451_v60  ;;  %v434_v63 = vpop.f32.mrf.mxu0  ;;  %v1796_v60 = vmax.f32 %v1726_v1, 1.0  ;;  %v554_v61 = vand.u32 2147483647, %v529_v27 }
  0xc9   : > { %v483_v0 = vpop.f32.mrf.mxu1 }
  0xca   : > { %855 = vrot.lane.b32.xlu2 %v1724_v62, %s1607_s26  ;;  %v1732_v4 = vadd.f32 %v483_v0, %v434_v63  ;;  %v1790_v55 = vmax.f32 %v1724_v62, 1.0  ;;  %v563_v63 = vmul.f32 %v1776_v41, %v562_v52  ;;  %v681_v0 = vmul.f32 %v1787_v45, %v1771_v38 }
  0xcb   : > { %vm555_vm8 = vcmp.eq.f32.partialorder %v554_v61, 8.507059e+37  ;;  %v586_v52 = vand.u32 2147483648, %v1774_v40  ;;  %vm524_vm15 = vcmp.gt.f32.partialorder %v1724_v62, 0.0  ;;  %v601_v54 = vand.u32 2147483648, %v1796_v60 }
  0xcc   : > { %839 = vrot.lane.b32.xlu1 %v1726_v1, %s1607_s26  ;;  %1515 = vrcp.f32 %v1790_v55  ;;  %v719_v35 = vand.u32 2147483647, %v1790_v55 }
  0xcd   : > { %1517 = vrcp.f32 %v1796_v60 }
  0xce   : > { %v454_v2 = vpop.f32.mrf.mxu2 }
  0xcf   : > { %v503_v3 = vpop.f32.mrf.mxu3 }
  0xd0   : > { %v1734_v5 = vadd.f32 %v503_v3, %v454_v2  ;;  %v436_v6 = vpop.f32.mrf.mxu0  ;;  %v553_v2 = vsel %vm552_vm7, %v1506_v33, %v549_v56  ;;  %v576_v3 = vmul.f32 %v1792_v57, %v1774_v40  ;;  %vm1890_vm7 = vmor %vm580_vm2, %vm581_vm3  ;;  %v587_v40 = vor.u32 1.1754944e-38, %v586_v52 }
  0xd1   : > { %v485_v7 = vpop.f32.mrf.mxu1 }
  0xd2   : > { %857 = vrot.lane.b32.xlu0 %v1734_v5, %s1607_s26  ;;  %841 = vrot.lane.b32.xlu2 %v1732_v4, %s1607_s26  ;;  %v1740_v10 = vadd.f32 %v485_v7, %v436_v6  ;;  %v557_v6 = vor.u32 1.1754944e-38, %v556_v58  ;;  %v1807_v7 = vmax.f32 %v1732_v4, 1.0  ;;  %v1849_v37 = vmax.f32 %v1734_v5, 1.0 }
  0xd4   : > { %1519 = vrcp.f32 %v1807_v7  ;;  %v614_v38 = vand.u32 2147483647, %v1807_v7 }
  0xd6   : > { %v456_v8 = vpop.f32.mrf.mxu2 }
  0xd7   : > { %v505_v9 = vpop.f32.mrf.mxu3 }
  0xd8   : > { %v1742_v11 = vadd.f32 %v505_v9, %v456_v8  ;;  %v439_v12 = vpop.f32.mrf.mxu0  ;;  %v558_v8 = vsel %vm555_vm8, %v557_v6, %v553_v2  ;;  %v564_v9 = vadd.f32 %v1776_v41, %v563_v63  ;;  %v692_v63 = vor.u32 1.1754944e-38, %v691_v36 }
  0xd9   : > { %v488_v13 = vpop.f32.mrf.mxu1  ;;  %v706_v2 = vand.u32 2147483648, %v1785_v51  ;;  %vm585_vm8 = vcmp.eq.f32.partialorder %v584_v50, 8.507059e+37  ;;  %v721_v36 = vand.u32 2147483648, %v1790_v55 }
  0xda   : > { %v1744_v14 = vadd.f32 %v488_v13, %v439_v12  ;;  %859 = vrot.lane.b32.xlu1 %v1742_v11, %s1607_s26  ;;  %843 = vrot.lane.b32.xlu2 %v1740_v10, %s1607_s26  ;;  %v682_v12 = vsub.f32 1.0, %v681_v0  ;;  %v1810_v13 = vpop.eup %1513  ;;  %v568_v42 = vsel %vm1821_vm12, %v1776_v41, %v564_v9  ;;  %v704_v0 = vand.u32 2147483647, %v1785_v51 }
  0xdb   : > { %v696_v28 = vmul.f32 %v1810_v13, %v1785_v51  ;;  %vm595_vm12 = vweird.f32 %v1796_v60  ;;  %v736_v51 = vand.u32 2147483648, %v1849_v37 }
  0xdc   : > { %845 = vrot.lane.b32.xlu0 %v1744_v14, %s1607_s26  ;;  %v683_v27 = vmul.f32 %v1787_v45, %v682_v12  ;;  %vm1907_vm11 = vcmp.eq.f32.partialorder %v704_v0, 8.507059e+37 }
  0xdd   : > { %v697_v41 = vsub.f32 1.0, %v696_v28  ;;  %v707_v28 = vor.u32 1.1754944e-38, %v706_v2 }
  0xde   : > { %v459_v15 = vpop.f32.mrf.mxu2  ;;  %v684_v39 = vadd.f32 %v1787_v45, %v683_v27 }
  0xdf   : > { %v508_v16 = vpop.f32.mrf.mxu3 }
  0xe0   : > { %v1752_v17 = vadd.f32 %v508_v16, %v459_v15  ;;  %v441_v18 = vpop.f32.mrf.mxu0  ;;  %v1813_v15 = vmax.f32 %v1740_v10, 1.0  ;;  %v571_v16 = vand.u32 2147483648, %v1767_v30  ;;  %v688_v48 = vsel %vm1874_vm6, %v1787_v45, %v684_v39 }
  0xe1   : > { %v490_v19 = vpop.f32.mrf.mxu1 }
  0xe2   : > { %v1754_v20 = vadd.f32 %v490_v19, %v441_v18  ;;  %861 = vrot.lane.b32.xlu2 %v1752_v17, %s1607_s26  ;;  %v577_v18 = vsub.f32 1.0, %v576_v3  ;;  %v569_v19 = vand.u32 2147483647, %v1767_v30  ;;  %1521 = vrcp.f32 %v1813_v15 }
  0xe3   : > { %v572_v31 = vor.u32 1.1754944e-38, %v571_v16  ;;  %1523 = vrcp.f32 %v1849_v37 }
  0xe4   : > { %847 = vrot.lane.b32.xlu1 %v1754_v20, %s1607_s26  ;;  %v578_v32 = vmul.f32 %v1792_v57, %v577_v18  ;;  %vm570_vm14 = vcmp.eq.f32.partialorder %v569_v19, 8.507059e+37 }
  0xe5   : > { %v573_v34 = vsel %vm570_vm14, %v572_v31, %v568_v42  ;;  %v1917_v42 = vmax.f32 %v1744_v14, 1.0 }
  0xe6   : > { %v461_v21 = vpop.f32.mrf.mxu2  ;;  %v786_v58 = vsel %vm514_vm13, %v573_v34, 0.0  ;;  %vm715_vm13 = vweird.f32 %v1790_v55 }
  0xe7   : > { %v510_v22 = vpop.f32.mrf.mxu3 }
  0xe8   : > { %v1760_v23 = vadd.f32 %v510_v22, %v461_v21  ;;  %v1819_v21 = vpop.eup %1515  ;;  %v785_v22 = vsel %vm513_vm10, %v558_v8, 0.0  ;;  %v698_v8 = vmul.f32 %v1810_v13, %v697_v41  ;;  %vm701_vm10 = vweird.f32 %v1810_v13 }
  0xe9   : > { %v1833_v29 = vpop.eup %1517  ;;  %v711_v33 = vmul.f32 %v1819_v21, %v1790_v55  ;;  %vm716_vm14 = vweird.f32 %v1819_v21 }
  0xea   : > { %863 = vrot.lane.b32.xlu0 %v1760_v23, %s1607_s26  ;;  %v591_v43 = vmul.f32 %v1833_v29, %v1796_v60  ;;  %v699_v25 = vadd.f32 %v1810_v13, %v698_v8  ;;  %vm596_vm2 = vweird.f32 %v1833_v29  ;;  %vm1954_vm3 = vmor %vm715_vm13, %vm716_vm14  ;;  %vm517_vm14 = vcmp.gt.f32.partialorder %v1732_v4, 0.0 }
  0xeb   : > { %v712_v49 = vsub.f32 1.0, %v711_v33  ;;  %vm1977_vm6 = vmor %vm595_vm12, %vm596_vm2  ;;  %vm730_vm2 = vweird.f32 %v1849_v37 }
  0xec   : > { %v592_v9 = vsub.f32 1.0, %v591_v43 }
  0xed   : > { %v713_v18 = vmul.f32 %v1819_v21, %v712_v49 }
 0x10c   : > { %v850_v44 = vpop.permute.xlu2 %849 }
 0x10d   : > { %v889_v47 = vmul.f32 %v850_v44, %v793_v46  ;;  %v1855_v44 = vmax.f32 %v1752_v17, 1.0  ;;  %v579_v46 = vadd.f32 %v1792_v57, %v578_v32  ;;  %v714_v32 = vadd.f32 %v1819_v21, %v713_v18 }
 0x10f   : > { %929 = vrot.lane.b32.xlu0 %v889_v47, %s1608_s27  ;;  %v1860_v47 = vpop.eup %1519  ;;  %1525 = vrcp.f32 %v1855_v44  ;;  %v583_v45 = vsel %vm1890_vm7, %v1792_v57, %v579_v46  ;;  %v693_v57 = vsel %vm1843_vm1, %v692_v63, %v688_v48  ;;  %vm1939_vm1 = vmor %vm700_vm9, %vm701_vm10  ;;  %v718_v61 = vsel %vm1954_vm3, %v1819_v21, %v714_v32 }
 0x110   : > { %v1866_v56 = vpop.eup %1521  ;;  %v606_v16 = vmul.f32 %v1860_v47, %v1807_v7  ;;  %v588_v24 = vsel %vm585_vm8, %v587_v40, %v583_v45  ;;  %v794_v39 = vsel %vm522_vm4, %v693_v57, 0.0  ;;  %v703_v53 = vsel %vm1939_vm1, %v1810_v13, %v699_v25 }
 0x111   : > { %v621_v19 = vmul.f32 %v1866_v56, %v1813_v15  ;;  %v1920_v31 = vpop.eup %1523  ;;  %v787_v41 = vsel %vm515_vm5, %v588_v24, 0.0  ;;  %1527 = vrcp.f32 %v1917_v42  ;;  %vm720_vm4 = vcmp.eq.f32.partialorder %v719_v35, 8.507059e+37 }
 0x112   : > { %v607_v27 = vsub.f32 1.0, %v606_v16  ;;  %v726_v55 = vmul.f32 %v1920_v31, %v1849_v37  ;;  %vm610_vm5 = vweird.f32 %v1807_v7  ;;  %v616_v48 = vand.u32 2147483648, %v1807_v7 }
 0x113   : > { %v622_v33 = vsub.f32 1.0, %v621_v19  ;;  %vm611_vm7 = vweird.f32 %v1860_v47  ;;  %v708_v8 = vsel %vm1907_vm11, %v707_v28, %v703_v53  ;;  %vm516_vm8 = vcmp.gt.f32.partialorder %v1726_v1, 0.0 }
 0x114   : > { %v608_v52 = vmul.f32 %v1860_v47, %v607_v27  ;;  %v602_v45 = vor.u32 1.1754944e-38, %v601_v54  ;;  %vm626_vm9 = vweird.f32 %v1866_v56  ;;  %v727_v19 = vsub.f32 1.0, %v726_v55  ;;  %vm2005_vm12 = vmor %vm610_vm5, %vm611_vm7 }
 0x115   : > { %v1925_v34 = vpop.eup %1525  ;;  %v623_v0 = vmul.f32 %v1866_v56, %v622_v33  ;;  %v617_v57 = vor.u32 1.1754944e-38, %v616_v48  ;;  %vm625_vm10 = vweird.f32 %v1813_v15  ;;  %v795_v27 = vsel %vm523_vm0, %v708_v8, 0.0 }
 0x116   : > { %v756_v2 = vmul.f32 %v1925_v34, %v1855_v44  ;;  %v609_v16 = vadd.f32 %v1860_v47, %v608_v52  ;;  %vm2019_vm13 = vmor %vm625_vm10, %vm626_vm9  ;;  %v728_v35 = vmul.f32 %v1920_v31, %v727_v19  ;;  %vm518_vm0 = vcmp.gt.f32.partialorder %v1740_v10, 0.0 }
 0x117   : > { %v624_v18 = vadd.f32 %v1866_v56, %v623_v0  ;;  %vm731_vm3 = vweird.f32 %v1920_v31  ;;  %v766_v1 = vand.u32 2147483648, %v1855_v44  ;;  %vm760_vm5 = vweird.f32 %v1855_v44 }
 0x118   : > { %v757_v40 = vsub.f32 1.0, %v756_v2  ;;  %v729_v53 = vadd.f32 %v1920_v31, %v728_v35  ;;  %v734_v0 = vand.u32 2147483647, %v1849_v37  ;;  %vm640_vm10 = vweird.f32 %v1917_v42 }
 0x119   : > { %v628_v59 = vsel %vm2019_vm13, %v1866_v56, %v624_v18  ;;  %v2037_v56 = vmax.f32 %v1742_v11, 1.0  ;;  %v767_v21 = vor.u32 1.1754944e-38, %v766_v1  ;;  %v646_v18 = vand.u32 2147483648, %v1917_v42 }
 0x11a   : > { %v758_v33 = vmul.f32 %v1925_v34, %v757_v40  ;;  %vm735_vm9 = vcmp.eq.f32.partialorder %v734_v0, 8.507059e+37  ;;  %vm525_vm13 = vcmp.gt.f32.partialorder %v1734_v5, 0.0  ;;  %v644_v19 = vand.u32 2147483647, %v1917_v42 }
 0x11e   : > { %v834_v26 = vpop.permute.xlu0 %833 }
 0x11f   : > { %v881_v30 = vmul.f32 %v834_v26, %v785_v22  ;;  %v593_v26 = vmul.f32 %v1833_v29, %v592_v9  ;;  %v1995_v22 = vpop.eup %1527 }
 0x121   : > { %913 = vrot.lane.b32.xlu1 %v881_v30, %s1608_s27  ;;  %v599_v30 = vand.u32 2147483647, %v1796_v60  ;;  %v594_v50 = vadd.f32 %v1833_v29, %v593_v26  ;;  %v629_v26 = vand.u32 2147483647, %v1813_v15 }
 0x123   : > { %v598_v9 = vsel %vm1977_vm6, %v1833_v29, %v594_v50  ;;  %v631_v29 = vand.u32 2147483648, %v1813_v15  ;;  %vm600_vm11 = vcmp.eq.f32.partialorder %v599_v30, 8.507059e+37  ;;  %v613_v30 = vsel %vm2005_vm12, %v1860_v47, %v609_v16  ;;  %vm2058_vm6 = vmor %vm730_vm2, %vm731_vm3 }
 0x124   : > { %v1881_v3 = vpop.permute.xlu2 %855  ;;  %v603_v32 = vsel %vm600_vm11, %v602_v45, %v598_v9  ;;  %v2031_v47 = vmax.f32 %v1760_v23, 1.0  ;;  %vm630_vm1 = vcmp.eq.f32.partialorder %v629_v26, 8.507059e+37  ;;  %vm641_vm11 = vweird.f32 %v1995_v22 }
 0x125   : > { %vm527_vm12 = vcmp.gt.f32.partialorder %v1752_v17, 0.0 }
 0x126   : > { %v836_v6 = vpop.permute.xlu0 %835 }
 0x127   : > { %v882_v12 = vmul.f32 %v836_v6, %v786_v58  ;;  %v722_v6 = vor.u32 1.1754944e-38, %v721_v36  ;;  %v632_v36 = vor.u32 1.1754944e-38, %v631_v29 }
 0x129   : > { %915 = vrot.lane.b32.xlu2 %v882_v12, %s1608_s27  ;;  %v1990_v12 = vmax.f32 %v1754_v20, 1.0  ;;  %v723_v60 = vsel %vm720_vm4, %v722_v6, %v718_v61  ;;  %v633_v43 = vsel %vm630_vm1, %v632_v36, %v628_v59  ;;  %vm761_vm4 = vweird.f32 %v1925_v34 }
 0x12a   : > { %v796_v24 = vsel %vm524_vm15, %v723_v60, 0.0  ;;  %vm615_vm15 = vcmp.eq.f32.partialorder %v614_v38, 8.507059e+37  ;;  %v790_v52 = vsel %vm518_vm0, %v633_v43, 0.0  ;;  %vm762_vm7 = vmor %vm760_vm5, %vm761_vm4  ;;  %v733_v6 = vsel %vm2058_vm6, %v1920_v31, %v729_v53 }
 0x12b   : > { %1529 = vrcp.f32 %v1990_v12  ;;  %v892_v62 = vmul.f32 %v1881_v3, %v796_v24  ;;  %v636_v3 = vmul.f32 %v1995_v22, %v1917_v42  ;;  %vm519_vm1 = vcmp.gt.f32.partialorder %v1744_v14, 0.0 }
 0x12c   : > { %v1962_v63 = vpop.permute.xlu2 %841  ;;  %1531 = vrcp.f32 %v2031_v47  ;;  %vm655_vm2 = vweird.f32 %v1990_v12  ;;  %v659_v59 = vand.u32 2147483647, %v1990_v12  ;;  %v781_v43 = vand.u32 2147483648, %v2031_v47 }
 0x12d   : > { %v637_v50 = vsub.f32 1.0, %v636_v3  ;;  %1533 = vrcp.f32 %v2037_v56  ;;  %v749_v53 = vand.u32 2147483647, %v2037_v56 }
 0x12e   : > { %v852_v46 = vpop.permute.xlu0 %851  ;;  %v838_v49 = vpop.permute.xlu1 %837  ;;  %vm660_vm4 = vcmp.eq.f32.partialorder %v659_v59, 8.507059e+37 }
 0x12f   : > { %v890_v58 = vmul.f32 %v852_v46, %v794_v39  ;;  %v883_v13 = vmul.f32 %v838_v49, %v787_v41  ;;  %v618_v39 = vsel %vm615_vm15, %v617_v57, %v613_v30  ;;  %v788_v46 = vsel %vm516_vm8, %v603_v32, 0.0 }
 0x130   : > { %v759_v49 = vadd.f32 %v1925_v34, %v758_v33  ;;  %v789_v10 = vsel %vm517_vm14, %v618_v39, 0.0  ;;  %v638_v48 = vmul.f32 %v1995_v22, %v637_v50  ;;  %vm642_vm14 = vmor %vm640_vm10, %vm641_vm11  ;;  %vm645_vm15 = vcmp.eq.f32.partialorder %v644_v19, 8.507059e+37 }
 0x131   : > { %917 = vrot.lane.b32.xlu0 %v883_v13, %s1608_s27  ;;  %931 = vrot.lane.b32.xlu1 %v890_v58, %s1608_s27  ;;  %v2047_v54 = vpop.eup %1529  ;;  %v764_v58 = vand.u32 2147483647, %v1855_v44  ;;  %v885_v4 = vmul.f32 %v1962_v63, %v789_v10  ;;  %v737_v63 = vor.u32 1.1754944e-38, %v736_v51  ;;  %v661_v30 = vand.u32 2147483648, %v1990_v12 }
 0x132   : > { %v763_v44 = vsel %vm762_vm7, %v1925_v34, %v759_v49  ;;  %v651_v37 = vmul.f32 %v2047_v54, %v1990_v12  ;;  %v2077_v34 = vpop.eup %1531  ;;  %v639_v9 = vadd.f32 %v1995_v22, %v638_v48  ;;  %vm656_vm0 = vweird.f32 %v2047_v54 }
 0x133   : > { %vm765_vm8 = vcmp.eq.f32.partialorder %v764_v58, 8.507059e+37  ;;  %v738_v8 = vsel %vm735_vm9, %v737_v63, %v733_v6  ;;  %v2082_v16 = vpop.eup %1533  ;;  %v771_v57 = vmul.f32 %v2077_v34, %v2031_v47  ;;  %vm657_vm3 = vmor %vm655_vm2, %vm656_vm0  ;;  %v662_v39 = vor.u32 1.1754944e-38, %v661_v30 }
 0x134   : > { %v844_v41 = vpop.permute.xlu2 %843  ;;  %v768_v38 = vsel %vm765_vm8, %v767_v21, %v763_v44  ;;  %v652_v60 = vsub.f32 1.0, %v651_v37  ;;  %v797_v24 = vsel %vm525_vm13, %v738_v8, 0.0  ;;  %v741_v26 = vmul.f32 %v2082_v16, %v2037_v56  ;;  %v811_v8 = vld [vmem:[%s2134_s5 + $0x50] sm:$0xff] }
 0x135   : > { %v886_v2 = vmul.f32 %v844_v41, %v790_v52  ;;  %v799_v40 = vsel %vm527_vm12, %v768_v38, 0.0  ;;  %v643_v17 = vsel %vm642_vm14, %v1995_v22, %v639_v9  ;;  %v772_v5 = vsub.f32 1.0, %v771_v57 }
 0x136   : > { %v854_v28 = vpop.permute.xlu1 %853  ;;  %v742_v32 = vsub.f32 1.0, %v741_v26  ;;  %vm776_vm5 = vweird.f32 %v2077_v34  ;;  %vm746_vm6 = vweird.f32 %v2082_v16  ;;  %vm775_vm7 = vweird.f32 %v2031_v47 }
 0x137   : > { %v891_v15 = vmul.f32 %v854_v28, %v795_v27  ;;  %v653_v27 = vmul.f32 %v2047_v54, %v652_v60  ;;  %v647_v28 = vor.u32 1.1754944e-38, %v646_v18  ;;  %v773_v33 = vmul.f32 %v2077_v34, %v772_v5  ;;  %vm777_vm9 = vmor %vm775_vm7, %vm776_vm5 }
 0x138   : > { %v743_v3 = vmul.f32 %v2082_v16, %v742_v32  ;;  %v751_v49 = vand.u32 2147483648, %v2037_v56  ;;  %vm520_vm8 = vcmp.gt.f32.partialorder %v1754_v20, 0.0  ;;  %vm745_vm10 = vweird.f32 %v2037_v56 }
 0x139   : > { %933 = vrot.lane.b32.xlu2 %v891_v15, %s1608_s27  ;;  %935 = vrot.lane.b32.xlu0 %v892_v62, %s1608_s27  ;;  %v648_v42 = vsel %vm645_vm15, %v647_v28, %v643_v17  ;;  %v654_v62 = vadd.f32 %v2047_v54, %v653_v27  ;;  %v774_v14 = vadd.f32 %v2077_v34, %v773_v33  ;;  %vm747_vm11 = vmor %vm745_vm10, %vm746_vm6  ;;  %v782_v51 = vor.u32 1.1754944e-38, %v781_v43  ;;  %v805_v17 = vld [vmem:[%s2134_s5 + $0x20] sm:$0xff] }
 0x13a   : > { %v791_v15 = vsel %vm519_vm1, %v648_v42, 0.0  ;;  %v744_v12 = vadd.f32 %v2082_v16, %v743_v3  ;;  %vm750_vm13 = vcmp.eq.f32.partialorder %v749_v53, 8.507059e+37  ;;  %vm528_vm14 = vcmp.gt.f32.partialorder %v1760_v23, 0.0 }
 0x13b   : > { %v658_v36 = vsel %vm657_vm3, %v2047_v54, %v654_v62  ;;  %v778_v10 = vsel %vm777_vm9, %v2077_v34, %v774_v14  ;;  %vm526_vm15 = vcmp.gt.f32.partialorder %v1742_v11, 0.0  ;;  %v809_v11 = vld [vmem:[%s2134_s5 + $0x40] sm:$0xff]  ;;  %vm1281_vm1 = vcmask 7168  }
 0x13c   : > { %v862_v31 = vpop.permute.xlu2 %861  ;;  %v663_v41 = vsel %vm660_vm4, %v662_v39, %v658_v36  ;;  %v748_v52 = vsel %vm747_vm11, %v2082_v16, %v744_v12 }
 0x13d   : > { %v895_v29 = vmul.f32 %v862_v31, %v799_v40  ;;  %v792_v54 = vsel %vm520_vm8, %v663_v41, 0.0  ;;  %v801_v31 = vld [vmem:[%s2134_s5] sm:$0xff] }
 0x13e   : > { %v840_v13 = vpop.permute.xlu1 %839 }
 0x13f   : > { %v884_v55 = vmul.f32 %v840_v13, %v788_v46  ;;  %v779_v46 = vand.u32 2147483647, %v2031_v47  ;;  %v752_v47 = vor.u32 1.1754944e-38, %v751_v49  ;;  %v810_v49 = vld [vmem:[%s2134_s5 + $0x48] sm:$0xff] }
 0x141   : > { %921 = vrot.lane.b32.xlu2 %v885_v4, %s1608_s27  ;;  %923 = vrot.lane.b32.xlu0 %v886_v2, %s1608_s27  ;;  %vm780_vm12 = vcmp.eq.f32.partialorder %v779_v46, 8.507059e+37  ;;  %v753_v58 = vsel %vm750_vm13, %v752_v47, %v748_v52  ;;  %v802_v2 = vld [vmem:[%s2134_s5 + $0x8] sm:$0xff]  ;;  %v803_v46 = vld [vmem:[%s2134_s5 + $0x10] sm:$0xff] }
 0x142   : > { %919 = vrot.lane.b32.xlu1 %v884_v55, %s1608_s27  ;;  %v783_v20 = vsel %vm780_vm12, %v782_v51, %v778_v10  ;;  %v798_v0 = vsel %vm526_vm15, %v753_v58, 0.0 }
 0x143   : > { %v800_v56 = vsel %vm528_vm14, %v783_v20, 0.0 }
 0x144   : > { %v858_v45 = vpop.permute.xlu0 %857 }
 0x145   : > { %v893_v25 = vmul.f32 %v858_v45, %v797_v24 }
 0x149   : > { %941 = vrot.lane.b32.xlu0 %v895_v29, %s1608_s27 }
 0x14a   : > { %937 = vrot.lane.b32.xlu1 %v893_v25, %s1608_s27 }
 0x14c   : > { %v860_v22 = vpop.permute.xlu1 %859 }
 0x14d   : > { %v894_v4 = vmul.f32 %v860_v22, %v798_v0  ;;  %v812_v0 = vld [vmem:[%s2134_s5 + $0x58] sm:$0xff] }
 0x14e   : > { %v846_v7 = vpop.permute.xlu0 %845 }
 0x14f   : > { %v887_v35 = vmul.f32 %v846_v7, %v791_v15 }
 0x152   : > { %925 = vrot.lane.b32.xlu1 %v887_v35, %s1608_s27 }
 0x156   : > { %v848_v50 = vpop.permute.xlu1 %847 }
 0x157   : > { %v888_v1 = vmul.f32 %v848_v50, %v792_v54 }
 0x159   : > { %927 = vrot.lane.b32.xlu2 %v888_v1, %s1608_s27 }
 0x15c   : > { %v864_v13 = vpop.permute.xlu0 %863 }
 0x15d   : > { %v896_v61 = vmul.f32 %v864_v13, %v800_v56 }
 0x15f   : > { %943 = vrot.lane.b32.xlu1 %v896_v61, %s1608_s27 }
 0x161   : > { %939 = vrot.lane.b32.xlu2 %v894_v4, %s1608_s27 }
 0x181   : > { %v930_v23 = vpop.permute.xlu0 %929 }
 0x182   : > { %v969_v55 = vadd.f32 %v930_v23, %v809_v11 }
 0x183   : > { %v916_v44 = vpop.permute.xlu2 %915 }
 0x184   : > { %v1450_v6 = vmul.f32 -1.442695, %v969_v55  ;;  %v962_v48 = vadd.f32 %v916_v44, %v802_v2 }
 0x186   : > { %1535 = vpow2.f32 %v1450_v6  ;;  %v1443_v37 = vmul.f32 -1.442695, %v962_v48 }
 0x188   : > { %1537 = vpow2.f32 %v1443_v37 }
 0x18c   : > { %v1536_v21 = vpop.eup %1535 }
 0x18d   : > { %v1033_v63 = vadd.f32 1.0, %v1536_v21 }
 0x18e   : > { %v1538_v34 = vpop.eup %1537 }
 0x18f   : > { %1539 = vrcp.f32 %v1033_v63  ;;  %v1026_v38 = vadd.f32 1.0, %v1538_v34  ;;  %v1172_v25 = vand.u32 2147483648, %v1033_v63  ;;  %v1170_v28 = vand.u32 2147483647, %v1033_v63 }
 0x190   : > { %vm1166_vm2 = vweird.f32 %v1033_v63 }
 0x191   : > { %1541 = vrcp.f32 %v1026_v38  ;;  %v1067_v62 = vand.u32 2147483648, %v1026_v38  ;;  %v1173_v22 = vor.u32 1.1754944e-38, %v1172_v25  ;;  %v1065_v15 = vand.u32 2147483647, %v1026_v38 }
 0x192   : > { %vm1171_vm5 = vcmp.eq.f32.partialorder %v1170_v28, 8.507059e+37  ;;  %vm1061_vm6 = vweird.f32 %v1026_v38 }
 0x193   : > { %v934_v9 = vpop.permute.xlu2 %933  ;;  %v914_v60 = vpop.permute.xlu1 %913  ;;  %v1068_v41 = vor.u32 1.1754944e-38, %v1067_v62  ;;  %vm1066_vm8 = vcmp.eq.f32.partialorder %v1065_v15, 8.507059e+37 }
 0x194   : > { %v971_v16 = vadd.f32 %v934_v9, %v811_v8  ;;  %v961_v45 = vadd.f32 %v914_v60, %v801_v31 }
 0x195   : > { %v1540_v18 = vpop.eup %1539 }
 0x196   : > { %v1162_v40 = vmul.f32 %v1540_v18, %v1033_v63  ;;  %v1452_v19 = vmul.f32 -1.442695, %v971_v16  ;;  %v1442_v57 = vmul.f32 -1.442695, %v961_v45  ;;  %vm1167_vm0 = vweird.f32 %v1540_v18 }
 0x197   : > { %v1542_v29 = vpop.eup %1541  ;;  %vm1168_vm3 = vmor %vm1166_vm2, %vm1167_vm0 }
 0x198   : > { %v1163_v24 = vsub.f32 1.0, %v1162_v40  ;;  %1543 = vpow2.f32 %v1452_v19  ;;  %v1057_v26 = vmul.f32 %v1542_v29, %v1026_v38  ;;  %vm1062_vm4 = vweird.f32 %v1542_v29 }
 0x199   : > { %1545 = vpow2.f32 %v1442_v57  ;;  %vm1063_vm7 = vmor %vm1061_vm6, %vm1062_vm4 }
 0x19a   : > { %v1164_v27 = vmul.f32 %v1540_v18, %v1163_v24  ;;  %v1058_v5 = vsub.f32 1.0, %v1057_v26 }
 0x19b   : > { %v922_v42 = vpop.permute.xlu2 %921 }
 0x19c   : > { %v1165_v32 = vadd.f32 %v1540_v18, %v1164_v27  ;;  %v965_v30 = vadd.f32 %v922_v42, %v805_v17  ;;  %v1059_v7 = vmul.f32 %v1542_v29, %v1058_v5  ;;  %v804_v5 = vld [vmem:[%s2134_s5 + $0x18] sm:$0xff] }
 0x19e   : > { %v1544_v59 = vpop.eup %1543  ;;  %v1169_v33 = vsel %vm1168_vm3, %v1540_v18, %v1165_v32  ;;  %v1446_v35 = vmul.f32 -1.442695, %v965_v30  ;;  %v1060_v39 = vadd.f32 %v1542_v29, %v1059_v7 }
 0x19f   : > { %v1546_v3 = vpop.eup %1545  ;;  %v1174_v36 = vsel %vm1171_vm5, %v1173_v22, %v1169_v33  ;;  %v1035_v14 = vadd.f32 1.0, %v1544_v59  ;;  %v808_v22 = vld [vmem:[%s2134_s5 + $0x38] sm:$0xff] }
 0x1a0   : > { %1290 = vst.msk [vmem:[%s2146_s7 + $0x40] sm:$0xff] %vm1281_vm1, %v1174_v36  ;;  %v1025_v43 = vadd.f32 1.0, %v1546_v3  ;;  %1547 = vpow2.f32 %v1446_v35  ;;  %v1064_v12 = vsel %vm1063_vm7, %v1542_v29, %v1060_v39  ;;  %v806_v29 = vld [vmem:[%s2134_s5 + $0x28] sm:$0xff] }
 0x1a1   : > { %1549 = vrcp.f32 %v1035_v14  ;;  %v1069_v53 = vsel %vm1066_vm8, %v1068_v41, %v1064_v12  ;;  %v1200_v11 = vand.u32 2147483647, %v1035_v14  ;;  %v1202_v23 = vand.u32 2147483648, %v1035_v14 }
 0x1a2   : > { %1551 = vrcp.f32 %v1025_v43  ;;  %1283 = vst.msk [vmem:[%s2146_s7 + $0x8] sm:$0xff] %vm1281_vm1, %v1069_v53  ;;  %v1052_v6 = vand.u32 2147483648, %v1025_v43  ;;  %v1050_v21 = vand.u32 2147483647, %v1025_v43  ;;  %vm1196_vm11 = vweird.f32 %v1035_v14 }
 0x1a3   : > { %v918_v50 = vpop.permute.xlu0 %917  ;;  %v932_v54 = vpop.permute.xlu1 %931  ;;  %vm1046_vm12 = vweird.f32 %v1025_v43  ;;  %vm1201_vm14 = vcmp.eq.f32.partialorder %v1200_v11, 8.507059e+37  ;;  %v1203_v31 = vor.u32 1.1754944e-38, %v1202_v23 }
 0x1a4   : > { %v963_v10 = vadd.f32 %v918_v50, %v803_v46  ;;  %v970_v1 = vadd.f32 %v932_v54, %v810_v49  ;;  %v1053_v18 = vor.u32 1.1754944e-38, %v1052_v6  ;;  %vm1051_vm0 = vcmp.eq.f32.partialorder %v1050_v21, 8.507059e+37  ;;  %v815_v50 = vld [vmem:[%s2134_s5 + $0x70] sm:$0xff]  ;;  %v813_v54 = vld [vmem:[%s2134_s5 + $0x60] sm:$0xff] }
 0x1a6   : > { %v1548_v51 = vpop.eup %1547  ;;  %v1444_v52 = vmul.f32 -1.442695, %v963_v10  ;;  %v1451_v47 = vmul.f32 -1.442695, %v970_v1 }
 0x1a7   : > { %v1550_v20 = vpop.eup %1549  ;;  %v2154_v58 = vadd.f32 1.0, %v1548_v51 }
 0x1a8   : > { %v1552_v56 = vpop.eup %1551  ;;  %v1192_v13 = vmul.f32 %v1550_v20, %v1035_v14  ;;  %1553 = vpow2.f32 %v1444_v52  ;;  %vm1197_vm9 = vweird.f32 %v1550_v20 }
 0x1a9   : > { %v1042_v61 = vmul.f32 %v1552_v56, %v1025_v43  ;;  %1555 = vrcp.f32 %v2154_v58  ;;  %vm1047_vm10 = vweird.f32 %v1552_v56  ;;  %vm1198_vm13 = vmor %vm1196_vm11, %vm1197_vm9  ;;  %v1110_v26 = vand.u32 2147483647, %v2154_v58 }
 0x1aa   : > { %v1193_v4 = vsub.f32 1.0, %v1192_v13  ;;  %1557 = vpow2.f32 %v1451_v47  ;;  %vm1048_vm15 = vmor %vm1046_vm12, %vm1047_vm10  ;;  %v1112_v17 = vand.u32 2147483648, %v2154_v58  ;;  %vm1106_vm3 = vweird.f32 %v2154_v58  ;;  %v814_v13 = vld [vmem:[%s2134_s5 + $0x68] sm:$0xff] }
 0x1ab   : > { %v1043_v2 = vsub.f32 1.0, %v1042_v61  ;;  %v936_v55 = vpop.permute.xlu0 %935  ;;  %vm1111_vm4 = vcmp.eq.f32.partialorder %v1110_v26, 8.507059e+37 }
 0x1ac   : > { %v1194_v44 = vmul.f32 %v1550_v20, %v1193_v4  ;;  %v972_v48 = vadd.f32 %v936_v55, %v812_v0  ;;  %v1113_v3 = vor.u32 1.1754944e-38, %v1112_v17 }
 0x1ad   : > { %v1044_v37 = vmul.f32 %v1552_v56, %v1043_v2 }
 0x1ae   : > { %v1554_v63 = vpop.eup %1553  ;;  %v1195_v34 = vadd.f32 %v1550_v20, %v1194_v44  ;;  %v1453_v38 = vmul.f32 -1.442695, %v972_v48 }
 0x1af   : > { %v1556_v8 = vpop.eup %1555  ;;  %v1045_v9 = vadd.f32 %v1552_v56, %v1044_v37  ;;  %v2158_v60 = vadd.f32 1.0, %v1554_v63 }
 0x1b0   : > { %v1558_v16 = vpop.eup %1557  ;;  %v1199_v45 = vsel %vm1198_vm13, %v1550_v20, %v1195_v34  ;;  %v1102_v40 = vmul.f32 %v1556_v8, %v2154_v58  ;;  %1559 = vpow2.f32 %v1453_v38  ;;  %vm1107_vm2 = vweird.f32 %v1556_v8 }
 0x1b1   : > { %v1204_v19 = vsel %vm1201_vm14, %v1203_v31, %v1199_v45  ;;  %v1049_v57 = vsel %vm1048_vm15, %v1552_v56, %v1045_v9  ;;  %1561 = vrcp.f32 %v2158_v60  ;;  %v2170_v27 = vadd.f32 1.0, %v1558_v16  ;;  %vm1108_vm5 = vmor %vm1106_vm3, %vm1107_vm2 }
 0x1b2   : > { %1292 = vst.msk [vmem:[%s2146_s7 + $0x50] sm:$0xff] %vm1281_vm1, %v1204_v19  ;;  %v1054_v24 = vsel %vm1051_vm0, %v1053_v18, %v1049_v57  ;;  %v1103_v25 = vsub.f32 1.0, %v1102_v40  ;;  %v1080_v36 = vand.u32 2147483647, %v2158_v60  ;;  %v1082_v12 = vand.u32 2147483648, %v2158_v60 }
 0x1b3   : > { %1282 = vst.msk [vmem:[%s2146_s7] sm:$0xff] %vm1281_vm1, %v1054_v24  ;;  %v924_v28 = vpop.permute.xlu0 %923  ;;  %v928_v42 = vpop.permute.xlu2 %927  ;;  %1563 = vrcp.f32 %v2170_v27  ;;  %vm1076_vm6 = vweird.f32 %v2158_v60  ;;  %v1185_v0 = vand.u32 2147483647, %v2170_v27  ;;  %v1187_v44 = vand.u32 2147483648, %v2170_v27 }
 0x1b4   : > { %v1104_v32 = vmul.f32 %v1556_v8, %v1103_v25  ;;  %v966_v62 = vadd.f32 %v924_v28, %v806_v29  ;;  %v920_v30 = vpop.permute.xlu1 %919  ;;  %v968_v14 = vadd.f32 %v928_v42, %v808_v22  ;;  %vm2187_vm7 = vcmp.eq.f32.partialorder %v1080_v36, 8.507059e+37 }
 0x1b5   : > { %v964_v33 = vadd.f32 %v920_v30, %v804_v5  ;;  %v1083_v20 = vor.u32 1.1754944e-38, %v1082_v12  ;;  %vm1181_vm11 = vweird.f32 %v2170_v27  ;;  %vm2204_vm12 = vcmp.eq.f32.partialorder %v1185_v0, 8.507059e+37  ;;  %v807_v5 = vld [vmem:[%s2134_s5 + $0x30] sm:$0xff] }
 0x1b6   : > { %v1560_v7 = vpop.eup %1559  ;;  %v1105_v15 = vadd.f32 %v1556_v8, %v1104_v32  ;;  %v1447_v59 = vmul.f32 -1.442695, %v966_v62  ;;  %v1449_v51 = vmul.f32 -1.442695, %v968_v14  ;;  %v1188_v16 = vor.u32 1.1754944e-38, %v1187_v44 }
 0x1b7   : > { %v1562_v35 = vpop.eup %1561  ;;  %v2177_v39 = vadd.f32 1.0, %v1560_v7  ;;  %v1445_v53 = vmul.f32 -1.442695, %v964_v33 }
 0x1b8   : > { %v1109_v41 = vsel %vm1108_vm5, %v1556_v8, %v1105_v15  ;;  %v1072_v43 = vmul.f32 %v1562_v35, %v2158_v60  ;;  %1565 = vpow2.f32 %v1447_v59  ;;  %vm1077_vm8 = vweird.f32 %v1562_v35 }
 0x1b9   : > { %v1114_v46 = vsel %vm1111_vm4, %v1113_v3, %v1109_v41  ;;  %1567 = vrcp.f32 %v2177_v39  ;;  %v1564_v10 = vpop.eup %1563  ;;  %vm1078_vm9 = vmor %vm1076_vm6, %vm1077_vm8  ;;  %v1215_v40 = vand.u32 2147483647, %v2177_v39  ;;  %v1217_v19 = vand.u32 2147483648, %v2177_v39 }
 0x1ba   : > { %1286 = vst.msk [vmem:[%s2146_s7 + $0x20] sm:$0xff] %vm1281_vm1, %v1114_v46  ;;  %v1073_v49 = vsub.f32 1.0, %v1072_v43  ;;  %v1177_v58 = vmul.f32 %v1564_v10, %v2170_v27  ;;  %1569 = vpow2.f32 %v1445_v53  ;;  %vm1182_vm10 = vweird.f32 %v1564_v10 }
 0x1bb   : > { %v942_v52 = vpop.permute.xlu0 %941  ;;  %v940_v61 = vpop.permute.xlu2 %939  ;;  %1571 = vpow2.f32 %v1449_v51  ;;  %vm1183_vm13 = vmor %vm1181_vm11, %vm1182_vm10  ;;  %vm1211_vm15 = vweird.f32 %v2177_v39  ;;  %v1218_v62 = vor.u32 1.1754944e-38, %v1217_v19  ;;  %vm1216_vm2 = vcmp.eq.f32.partialorder %v1215_v40, 8.507059e+37 }
 0x1bc   : > { %v1074_v47 = vmul.f32 %v1562_v35, %v1073_v49  ;;  %v938_v56 = vpop.permute.xlu1 %937  ;;  %v975_v4 = vadd.f32 %v942_v52, %v815_v50  ;;  %v1178_v55 = vsub.f32 1.0, %v1177_v58  ;;  %v974_v63 = vadd.f32 %v940_v61, %v814_v13 }
 0x1bd   : > { %v973_v11 = vadd.f32 %v938_v56, %v813_v54 }
 0x1be   : > { %v1566_v23 = vpop.eup %1565  ;;  %v1075_v2 = vadd.f32 %v1562_v35, %v1074_v47  ;;  %v1456_v37 = vmul.f32 -1.442695, %v975_v4  ;;  %v1179_v38 = vmul.f32 %v1564_v10, %v1178_v55  ;;  %v1455_v57 = vmul.f32 -1.442695, %v974_v63  ;;  %v816_v55 = vld [vmem:[%s2134_s5 + $0x78] sm:$0xff] }
 0x1bf   : > { %v1568_v6 = vpop.eup %1567  ;;  %v2198_v48 = vadd.f32 1.0, %v1566_v23  ;;  %v1454_v21 = vmul.f32 -1.442695, %v973_v11 }
 0x1c0   : > { %v1079_v34 = vsel %vm1078_vm9, %v1562_v35, %v1075_v2  ;;  %v1207_v8 = vmul.f32 %v1568_v6, %v2177_v39  ;;  %v1180_v60 = vadd.f32 %v1564_v10, %v1179_v38  ;;  %v1570_v18 = vpop.eup %1569  ;;  %vm1212_vm14 = vweird.f32 %v1568_v6 }
 0x1c1   : > { %v1084_v31 = vsel %vm2187_vm7, %v1083_v20, %v1079_v34  ;;  %1573 = vrcp.f32 %v2198_v48  ;;  %v1572_v29 = vpop.eup %1571  ;;  %v2213_v26 = vadd.f32 1.0, %v1570_v18  ;;  %vm1213_vm0 = vmor %vm1211_vm15, %vm1212_vm14  ;;  %v1125_v15 = vand.u32 2147483647, %v2198_v48 }
 0x1c2   : > { %1284 = vst.msk [vmem:[%s2146_s7 + $0x10] sm:$0xff] %vm1281_vm1, %v1084_v31  ;;  %v1208_v45 = vsub.f32 1.0, %v1207_v8  ;;  %1575 = vpow2.f32 %v1456_v37  ;;  %v1184_v24 = vsel %vm1183_vm13, %v1564_v10, %v1180_v60  ;;  %v2217_v27 = vadd.f32 1.0, %v1572_v29 }
 0x1c3   : > { %1577 = vpow2.f32 %v1454_v21  ;;  %v1189_v17 = vsel %vm2204_vm12, %v1188_v16, %v1184_v24  ;;  %v1127_v35 = vand.u32 2147483648, %v2198_v48  ;;  %vm1121_vm3 = vweird.f32 %v2198_v48 }
 0x1c4   : > { %v1209_v25 = vmul.f32 %v1568_v6, %v1208_v45  ;;  %1579 = vpow2.f32 %v1455_v57  ;;  %1291 = vst.msk [vmem:[%s2146_s7 + $0x48] sm:$0xff] %vm1281_vm1, %v1189_v17  ;;  %v926_v42 = vpop.permute.xlu1 %925  ;;  %vm2235_vm5 = vcmp.eq.f32.partialorder %v1125_v15, 8.507059e+37  ;;  %vm1091_vm6 = vweird.f32 %v2213_v26 }
 0x1c5   : > { %1581 = vrcp.f32 %v2213_v26  ;;  %v967_v3 = vadd.f32 %v926_v42, %v807_v5  ;;  %v1128_v53 = vor.u32 1.1754944e-38, %v1127_v35  ;;  %v1095_v1 = vand.u32 2147483647, %v2213_v26 }
 0x1c6   : > { %v1210_v28 = vadd.f32 %v1568_v6, %v1209_v25  ;;  %1583 = vrcp.f32 %v2217_v27  ;;  %v1097_v47 = vand.u32 2147483648, %v2213_v26  ;;  %vm1151_vm8 = vweird.f32 %v2217_v27 }
 0x1c7   : > { %v1574_v32 = vpop.eup %1573  ;;  %v1448_v54 = vmul.f32 -1.442695, %v967_v3  ;;  %v1155_v20 = vand.u32 2147483647, %v2217_v27  ;;  %v1157_v13 = vand.u32 2147483648, %v2217_v27  ;;  %vm2257_vm10 = vcmp.eq.f32.partialorder %v1095_v1, 8.507059e+37 }
 0x1c8   : > { %v1576_v30 = vpop.eup %1575  ;;  %v1214_v22 = vsel %vm1213_vm0, %v1568_v6, %v1210_v28  ;;  %v1117_v7 = vmul.f32 %v1574_v32, %v2198_v48  ;;  %vm1122_vm4 = vweird.f32 %v1574_v32  ;;  %v1098_v37 = vor.u32 1.1754944e-38, %v1097_v47 }
 0x1c9   : > { %v1578_v59 = vpop.eup %1577  ;;  %v1219_v33 = vsel %vm1216_vm2, %v1218_v62, %v1214_v22  ;;  %v2230_v39 = vadd.f32 1.0, %v1576_v30  ;;  %vm1123_vm7 = vmor %vm1121_vm3, %vm1122_vm4  ;;  %vm2263_vm12 = vcmp.eq.f32.partialorder %v1155_v20, 8.507059e+37  ;;  %v1158_v38 = vor.u32 1.1754944e-38, %v1157_v13 }
 0x1ca   : > { %1293 = vst.msk [vmem:[%s2146_s7 + $0x58] sm:$0xff] %vm1281_vm1, %v1219_v33  ;;  %v1118_v36 = vsub.f32 1.0, %v1117_v7  ;;  %v2232_v14 = vadd.f32 1.0, %v1578_v59  ;;  %v1580_v41 = vpop.eup %1579 }
 0x1cb   : > { %v1582_v43 = vpop.eup %1581  ;;  %1585 = vrcp.f32 %v2230_v39  ;;  %v2251_v61 = vadd.f32 1.0, %v1580_v41  ;;  %v1260_v8 = vand.u32 2147483647, %v2230_v39  ;;  %v1262_v16 = vand.u32 2147483648, %v2230_v39 }
 0x1cc   : > { %v1119_v12 = vmul.f32 %v1574_v32, %v1118_v36  ;;  %v1584_v49 = vpop.eup %1583  ;;  %v1087_v50 = vmul.f32 %v1582_v43, %v2213_v26  ;;  %1587 = vrcp.f32 %v2232_v14  ;;  %vm1092_vm9 = vweird.f32 %v1582_v43 }
 0x1cd   : > { %v1147_v51 = vmul.f32 %v1584_v49, %v2217_v27  ;;  %1589 = vpow2.f32 %v1448_v54  ;;  %vm1152_vm11 = vweird.f32 %v1584_v49  ;;  %vm1093_vm13 = vmor %vm1091_vm6, %vm1092_vm9  ;;  %v1232_v57 = vand.u32 2147483648, %v2232_v14 }
 0x1ce   : > { %v1120_v10 = vadd.f32 %v1574_v32, %v1119_v12  ;;  %v1088_v52 = vsub.f32 1.0, %v1087_v50  ;;  %1591 = vrcp.f32 %v2251_v61  ;;  %vm1153_vm14 = vmor %vm1151_vm8, %vm1152_vm11  ;;  %v1230_v28 = vand.u32 2147483647, %v2232_v14 }
 0x1cf   : > { %v1148_v56 = vsub.f32 1.0, %v1147_v51  ;;  %vm1256_vm2 = vweird.f32 %v2230_v39  ;;  %v1263_v62 = vor.u32 1.1754944e-38, %v1262_v16  ;;  %vm1226_vm4 = vweird.f32 %v2232_v14 }
 0x1d0   : > { %v1124_v58 = vsel %vm1123_vm7, %v1574_v32, %v1120_v10  ;;  %v1089_v4 = vmul.f32 %v1582_v43, %v1088_v52  ;;  %v1233_v7 = vor.u32 1.1754944e-38, %v1232_v57  ;;  %vm1231_vm7 = vcmp.eq.f32.partialorder %v1230_v28, 8.507059e+37 }
 0x1d1   : > { %v1129_v0 = vsel %vm2235_vm5, %v1128_v53, %v1124_v58  ;;  %v1586_v11 = vpop.eup %1585  ;;  %v1149_v2 = vmul.f32 %v1584_v49, %v1148_v56  ;;  %v944_v44 = vpop.permute.xlu1 %943  ;;  %vm1261_vm5 = vcmp.eq.f32.partialorder %v1260_v8, 8.507059e+37  ;;  %v1247_v35 = vand.u32 2147483648, %v2251_v61 }
 0x1d2   : > { %1287 = vst.msk [vmem:[%s2146_s7 + $0x28] sm:$0xff] %vm1281_vm1, %v1129_v0  ;;  %v1588_v6 = vpop.eup %1587  ;;  %v1090_v48 = vadd.f32 %v1582_v43, %v1089_v4  ;;  %v1252_v63 = vmul.f32 %v1586_v11, %v2230_v39  ;;  %v976_v45 = vadd.f32 %v944_v44, %v816_v55  ;;  %vm1257_vm15 = vweird.f32 %v1586_v11 }
 0x1d3   : > { %v1150_v34 = vadd.f32 %v1584_v49, %v1149_v2  ;;  %v1222_v31 = vmul.f32 %v1588_v6, %v2232_v14  ;;  %v1590_v29 = vpop.eup %1589  ;;  %vm1227_vm0 = vweird.f32 %v1588_v6  ;;  %vm1258_vm3 = vmor %vm1256_vm2, %vm1257_vm15  ;;  %v1245_v39 = vand.u32 2147483647, %v2251_v61 }
 0x1d4   : > { %v1094_v9 = vsel %vm1093_vm13, %v1582_v43, %v1090_v48  ;;  %v1253_v60 = vsub.f32 1.0, %v1252_v63  ;;  %v1457_v26 = vmul.f32 -1.442695, %v976_v45  ;;  %v1592_v17 = vpop.eup %1591  ;;  %v1031_v5 = vadd.f32 1.0, %v1590_v29  ;;  %vm1228_vm6 = vmor %vm1226_vm4, %vm1227_vm0 }
 0x1d5   : > { %v1099_v18 = vsel %vm2257_vm10, %v1098_v37, %v1094_v9  ;;  %v1154_v40 = vsel %vm1153_vm14, %v1584_v49, %v1150_v34  ;;  %v1223_v19 = vsub.f32 1.0, %v1222_v31  ;;  %v1237_v32 = vmul.f32 %v1592_v17, %v2251_v61 }
 0x1d6   : > { %1285 = vst.msk [vmem:[%s2146_s7 + $0x18] sm:$0xff] %vm1281_vm1, %v1099_v18  ;;  %v1159_v24 = vsel %vm2263_vm12, %v1158_v38, %v1154_v40  ;;  %v1254_v25 = vmul.f32 %v1586_v11, %v1253_v60  ;;  %1593 = vpow2.f32 %v1457_v26  ;;  %vm1242_vm8 = vweird.f32 %v1592_v17 }
 0x1d7   : > { %1289 = vst.msk [vmem:[%s2146_s7 + $0x38] sm:$0xff] %vm1281_vm1, %v1159_v24  ;;  %v1224_v27 = vmul.f32 %v1588_v6, %v1223_v19  ;;  %1595 = vrcp.f32 %v1031_v5  ;;  %v1238_v15 = vsub.f32 1.0, %v1237_v32  ;;  %vm1241_vm9 = vweird.f32 %v2251_v61 }
 0x1d8   : > { %v1255_v42 = vadd.f32 %v1586_v11, %v1254_v25  ;;  %vm1243_vm10 = vmor %vm1241_vm9, %vm1242_vm8  ;;  %v1248_v12 = vor.u32 1.1754944e-38, %v1247_v35  ;;  %vm1246_vm11 = vcmp.eq.f32.partialorder %v1245_v39, 8.507059e+37  ;;  %v1142_v10 = vand.u32 2147483648, %v1031_v5 }
 0x1d9   : > { %v1225_v30 = vadd.f32 %v1588_v6, %v1224_v27  ;;  %v1239_v36 = vmul.f32 %v1592_v17, %v1238_v15  ;;  %v1140_v51 = vand.u32 2147483647, %v1031_v5  ;;  %vm1136_vm13 = vweird.f32 %v1031_v5 }
 0x1da   : > { %v1259_v22 = vsel %vm1258_vm3, %v1586_v11, %v1255_v42  ;;  %v1143_v20 = vor.u32 1.1754944e-38, %v1142_v10 }
 0x1db   : > { %v1264_v59 = vsel %vm1261_vm5, %v1263_v62, %v1259_v22  ;;  %v1229_v33 = vsel %vm1228_vm6, %v1588_v6, %v1225_v30  ;;  %v1240_v41 = vadd.f32 %v1592_v17, %v1239_v36  ;;  %vm1141_vm15 = vcmp.eq.f32.partialorder %v1140_v51, 8.507059e+37 }
 0x1dc   : > { %1296 = vst.msk [vmem:[%s2146_s7 + $0x70] sm:$0xff] %vm1281_vm1, %v1264_v59  ;;  %v1234_v3 = vsel %vm1231_vm7, %v1233_v7, %v1229_v33  ;;  %v1594_v14 = vpop.eup %1593 }
 0x1dd   : > { %1294 = vst.msk [vmem:[%s2146_s7 + $0x60] sm:$0xff] %vm1281_vm1, %v1234_v3  ;;  %v1596_v43 = vpop.eup %1595  ;;  %v1040_v46 = vadd.f32 1.0, %v1594_v14  ;;  %v1244_v49 = vsel %vm1243_vm10, %v1592_v17, %v1240_v41 }
 0x1de   : > { %v1132_v53 = vmul.f32 %v1596_v43, %v1031_v5  ;;  %v1249_v50 = vsel %vm1246_vm11, %v1248_v12, %v1244_v49  ;;  %vm1137_vm12 = vweird.f32 %v1596_v43 }
 0x1df   : > { %1597 = vrcp.f32 %v1040_v46  ;;  %1295 = vst.msk [vmem:[%s2146_s7 + $0x68] sm:$0xff] %vm1281_vm1, %v1249_v50  ;;  %vm1138_vm14 = vmor %vm1136_vm13, %vm1137_vm12  ;;  %v1277_v0 = vand.u32 2147483648, %v1040_v46  ;;  %v1275_v11 = vand.u32 2147483647, %v1040_v46  ;;  %vm1271_vm2 = vweird.f32 %v1040_v46 }
 0x1e0   : > { %v1133_v54 = vsub.f32 1.0, %v1132_v53 }
 0x1e1   : > { %v1278_v2 = vor.u32 1.1754944e-38, %v1277_v0  ;;  %vm1276_vm4 = vcmp.eq.f32.partialorder %v1275_v11, 8.507059e+37 }
 0x1e2   : > { %v1134_v1 = vmul.f32 %v1596_v43, %v1133_v54 }
 0x1e4   : > { %v1135_v52 = vadd.f32 %v1596_v43, %v1134_v1 }
 0x1e5   : > { %v1598_v47 = vpop.eup %1597 }
 0x1e6   : > { %v1139_v58 = vsel %vm1138_vm14, %v1596_v43, %v1135_v52  ;;  %v1267_v56 = vmul.f32 %v1598_v47, %v1040_v46  ;;  %vm1272_vm0 = vweird.f32 %v1598_v47 }
 0x1e7   : > { %v1144_v13 = vsel %vm1141_vm15, %v1143_v20, %v1139_v58  ;;  %vm1273_vm3 = vmor %vm1271_vm2, %vm1272_vm0 }
 0x1e8   : > { %1288 = vst.msk [vmem:[%s2146_s7 + $0x30] sm:$0xff] %vm1281_vm1, %v1144_v13  ;;  %v1268_v61 = vsub.f32 1.0, %v1267_v56 }
 0x1ea   : > { %v1269_v4 = vmul.f32 %v1598_v47, %v1268_v61 }
 0x1ec   : > { %v1270_v23 = vadd.f32 %v1598_v47, %v1269_v4 }
 0x1ee   : > { %v1274_v55 = vsel %vm1273_vm3, %v1598_v47, %v1270_v23 }
 0x1ef   : > { %v1279_v44 = vsel %vm1276_vm4, %v1278_v2, %v1274_v55 }
 0x1f0   : > { %1297 = vst.msk [vmem:[%s2146_s7 + $0x78] sm:$0xff] %vm1281_vm1, %v1279_v44 }
 0x1f1 PF: > { %s13_s12 = sadd.s32 1, %s1605_s12  }
 0x1f2   : > { %p10_p5 = scmp.ge.s32.totalorder %s13_s12, 4  }
 0x1f4   :  { %12 = sbr.rel (!%p10_p5) target bundleno = 1 (0x1), region = 65 }

// kernel: weight_score_layer.2
= control target key start
LH: loop header
LB: loop body
LE: loop exit
PB: predicated region body
PF: predicated region fallthrough
CT: control target
= control target key end

     0   :  { %s1550_s18 = smov 0   ;;  %s2178_s0 = inlined_call_operand.vmem [shape: s8[256,256], index: 0, kind: input, shape index: {}]   ;;  %s2179_s1 = inlined_call_operand.vmem [shape: bf16[256,33], index: 1, kind: input, shape index: {}]   ;;  %s2180_s2 = inlined_call_operand.vmem [shape: f32[256,32], index: 2, kind: input, shape index: {}]   ;;  %s2181_s3 = inlined_call_operand.vmem [shape: f32[3,32], index: 3, kind: input, shape index: {}]   ;;  %s2182_s4 = inlined_call_operand.vmem [shape: bf16[256,2], index: 4, kind: output, shape index: {0}]   ;;  %s2183_s5 = inlined_call_operand.vmem [shape: f32[256,1], index: 5, kind: output, shape index: {1}]  }
   0x1 LB: > { %s1351_s19 = sadd.s32 4294967295, %s1517_s18   ;;  %p1355_p0 = scmp.ge.s32.totalorder %s1517_s18, 1  ;;  %s1517_s18 = sphi %s1550_s18, %s16_s18  }
   0x2   : > { %p203_p1 = scmp.lt.s32.totalorder %s1517_s18, 3 }
   0x4   : > { %p204_p2 = pnand %p1355_p0, %p203_p1 }
   0x5   : > { %s1356_s24 = sshll.u32 (!%p204_p2), %s1351_s19, 2  ;;  %s1359_s9 = sshll.u32 (!%p204_p2), %s1351_s19, 4 }
   0x6   : > { %207 = sbr.rel (%p204_p2) target bundleno = 515 (0x203), region = 36  ;;  %p243_p3 = scmp.lt.s32.totalorder (!%p204_p2), %s1356_s24, 7 }
   0x7   : > { %p250_p4 = scmp.lt.s32.totalorder (!%p204_p2), %s1359_s9, 31 }
   0xb   : > { %v1439_v0 = vld [vmem:[%s2179_s1 + $0x38] sm:$0xff]  ;;  %v1438_v2 = vld [vmem:[%s2179_s1 + $0x30] sm:$0xff]  ;;  %v1437_v4 = vld [vmem:[%s2179_s1 + $0x28] sm:$0xff]  ;;  %s2205_s24 = smov (!%p243_p3, %s1356_s24), 7  ;;  %s2207_s9 = smov (!%p250_p4, %s1359_s9), 31 }
   0xc   : > { %v1447_v1 = vld [vmem:[%s2179_s1 + $0x78] sm:$0xff]  ;;  %483 = vmatpush.bf16.msra.mxu0 %v1439_v0  ;;  %1448 = vmatpush.bf16.msra.mxu2 %v1439_v0  ;;  %v1446_v3 = vld [vmem:[%s2179_s1 + $0x70] sm:$0xff]  ;;  %v1445_v5 = vld [vmem:[%s2179_s1 + $0x68] sm:$0xff]  ;;  %s1431_s12 = sshll.u32 %s2205_s24, 4  ;;  %s1360_s10 = sshll.u32 %s2207_s9, 3 }
   0xd   : > { %532 = vmatpush.bf16.msra.mxu1 %v1447_v1  ;;  %1456 = vmatpush.bf16.msra.mxu3 %v1447_v1  ;;  %v1436_v6 = vld [vmem:[%s2179_s1 + $0x20] sm:$0xff]  ;;  %v1435_v8 = vld [vmem:[%s2179_s1 + $0x18] sm:$0xff]  ;;  %s1593_s21 = scalar_lea.vmem %s2178_s0, %s1431_s12  ;;  %v1434_v10 = vld [vmem:[%s2179_s1 + $0x10] sm:$0xff]  ;;  %s1926_s13 = scalar_lea.vmem %s2180_s2, %s1360_s10 }
   0xe   : > { %v1444_v7 = vld [vmem:[%s2179_s1 + $0x60] sm:$0xff]  ;;  %v1443_v9 = vld [vmem:[%s2179_s1 + $0x58] sm:$0xff]  ;;  %v1442_v13 = vld [vmem:[%s2179_s1 + $0x50] sm:$0xff]  ;;  %s2070_s23 = scalar_lea.vmem %s2183_s5, %s1360_s10  ;;  %s1362_s24 = sshll.u32 %s2207_s9, 2 }
   0xf   : > { %v267_v11 = vld [vmem:[%s1593_s21] sm:$0xff]  ;;  %v268_v14 = vld [vmem:[%s1593_s21 + $0x8] sm:$0xff]  ;;  %v269_v60 = vld [vmem:[%s1593_s21 + $0x10] sm:$0xff]  ;;  %s2079_s27 = scalar_lea.vmem %s2182_s4, %s1362_s24 }
  0x10   : > { %484 = vmatpush.bf16.msra.mxu0 %v1438_v2  ;;  %1449 = vmatpush.bf16.msra.mxu2 %v1438_v2  ;;  %v271_v12 = vld [vmem:[%s1593_s21 + $0x20] sm:$0xff]  ;;  %v272_v15 = vld [vmem:[%s1593_s21 + $0x28] sm:$0xff]  ;;  %v275_v16 = vunpack.c.0.s8 %v267_v11  ;;  %v277_v17 = vunpack.c.1.s8 %v267_v11  ;;  %v276_v21 = vunpack.c.0.s8 %v268_v14  ;;  %v278_v22 = vunpack.c.1.s8 %v268_v14  ;;  %v273_v61 = vld [vmem:[%s1593_s21 + $0x30] sm:$0xff] }
  0x11   : > { %533 = vmatpush.bf16.msra.mxu1 %v1446_v3  ;;  %1457 = vmatpush.bf16.msra.mxu3 %v1446_v3  ;;  %v291_v18 = vunpack.c.0.s8 %v271_v12  ;;  %v293_v19 = vunpack.c.1.s8 %v271_v12  ;;  %v1433_v20 = vld [vmem:[%s2179_s1 + $0x8] sm:$0xff]  ;;  %v292_v23 = vunpack.c.0.s8 %v272_v15  ;;  %v294_v24 = vunpack.c.1.s8 %v272_v15  ;;  %v1432_v30 = vld [vmem:[%s2179_s1] sm:$0xff]  ;;  %v270_v62 = vld [vmem:[%s1593_s21 + $0x18] sm:$0xff] }
  0x12   : > { %v1441_v25 = vld [vmem:[%s2179_s1 + $0x48] sm:$0xff]  ;;  %v307_v26 = vcvt.s32.f32 %v275_v16  ;;  %v309_v27 = vcvt.s32.f32 %v277_v17  ;;  %v308_v31 = vcvt.s32.f32 %v276_v21  ;;  %v310_v32 = vcvt.s32.f32 %v278_v22  ;;  %v1440_v35 = vld [vmem:[%s2179_s1 + $0x40] sm:$0xff]  ;;  %v274_v63 = vld [vmem:[%s1593_s21 + $0x38] sm:$0xff] }
  0x13   : > { %v323_v28 = vcvt.s32.f32 %v291_v18  ;;  %v325_v29 = vcvt.s32.f32 %v293_v19  ;;  %v324_v33 = vcvt.s32.f32 %v292_v23  ;;  %v326_v34 = vcvt.s32.f32 %v294_v24 }
  0x14   : > { %485 = vmatpush.bf16.msra.mxu0 %v1437_v4  ;;  %1450 = vmatpush.bf16.msra.mxu2 %v1437_v4  ;;  %v339_v36 = vpack.c.bf16 %v309_v27, %v307_v26  ;;  %v340_v38 = vpack.c.bf16 %v310_v32, %v308_v31  ;;  %v279_v40 = vunpack.c.2.s8 %v267_v11  ;;  %v281_v41 = vunpack.c.3.s8 %v267_v11 }
  0x15   : > { %534 = vmatpush.bf16.msra.mxu1 %v1445_v5  ;;  %1458 = vmatpush.bf16.msra.mxu3 %v1445_v5  ;;  %v347_v37 = vpack.c.bf16 %v325_v29, %v323_v28  ;;  %v348_v39 = vpack.c.bf16 %v326_v34, %v324_v33  ;;  %v295_v42 = vunpack.c.2.s8 %v271_v12  ;;  %v297_v43 = vunpack.c.3.s8 %v271_v12 }
  0x16   : > { %v280_v44 = vunpack.c.2.s8 %v268_v14  ;;  %v282_v45 = vunpack.c.3.s8 %v268_v14  ;;  %v296_v46 = vunpack.c.2.s8 %v272_v15  ;;  %v298_v47 = vunpack.c.3.s8 %v272_v15 }
  0x17   : > { %v311_v48 = vcvt.s32.f32 %v279_v40  ;;  %v313_v49 = vcvt.s32.f32 %v281_v41  ;;  %v327_v50 = vcvt.s32.f32 %v295_v42  ;;  %v329_v51 = vcvt.s32.f32 %v297_v43 }
  0x18   : > { %486 = vmatpush.bf16.msra.mxu0 %v1436_v6  ;;  %1451 = vmatpush.bf16.msra.mxu2 %v1436_v6  ;;  %v312_v52 = vcvt.s32.f32 %v280_v44  ;;  %v314_v53 = vcvt.s32.f32 %v282_v45  ;;  %v328_v54 = vcvt.s32.f32 %v296_v46  ;;  %v330_v55 = vcvt.s32.f32 %v298_v47 }
  0x19   : > { %535 = vmatpush.bf16.msra.mxu1 %v1444_v7  ;;  %1459 = vmatpush.bf16.msra.mxu3 %v1444_v7  ;;  %v341_v56 = vpack.c.bf16 %v313_v49, %v311_v48  ;;  %v349_v57 = vpack.c.bf16 %v329_v51, %v327_v50  ;;  %v283_v0 = vunpack.c.0.s8 %v269_v60  ;;  %v285_v1 = vunpack.c.1.s8 %v269_v60 }
  0x1a   : > { %v342_v58 = vpack.c.bf16 %v314_v53, %v312_v52  ;;  %v350_v59 = vpack.c.bf16 %v330_v55, %v328_v54  ;;  %v299_v2 = vunpack.c.0.s8 %v273_v61  ;;  %v301_v3 = vunpack.c.1.s8 %v273_v61 }
  0x1b   : > { %v284_v4 = vunpack.c.0.s8 %v270_v62  ;;  %v286_v5 = vunpack.c.1.s8 %v270_v62  ;;  %v300_v6 = vunpack.c.0.s8 %v274_v63  ;;  %v302_v7 = vunpack.c.1.s8 %v274_v63 }
  0x1c   : > { %487 = vmatpush.bf16.msra.mxu0 %v1435_v8  ;;  %1452 = vmatpush.bf16.msra.mxu2 %v1435_v8  ;;  %v315_v8 = vcvt.s32.f32 %v283_v0  ;;  %v333_v11 = vcvt.s32.f32 %v301_v3  ;;  %v289_v21 = vunpack.c.3.s8 %v269_v60  ;;  %v303_v22 = vunpack.c.2.s8 %v273_v61 }
  0x1d   : > { %536 = vmatpush.bf16.msra.mxu1 %v1443_v9  ;;  %1460 = vmatpush.bf16.msra.mxu3 %v1443_v9  ;;  %v317_v9 = vcvt.s32.f32 %v285_v1  ;;  %v316_v12 = vcvt.s32.f32 %v284_v4  ;;  %v332_v14 = vcvt.s32.f32 %v300_v6  ;;  %v334_v15 = vcvt.s32.f32 %v302_v7 }
  0x1e   : > { %v305_v23 = vunpack.c.3.s8 %v273_v61  ;;  %v288_v24 = vunpack.c.2.s8 %v270_v62  ;;  %v304_v26 = vunpack.c.2.s8 %v274_v63  ;;  %v306_v27 = vunpack.c.3.s8 %v274_v63 }
  0x1f   : > { %v343_v16 = vpack.c.bf16 %v317_v9, %v315_v8  ;;  %v352_v19 = vpack.c.bf16 %v334_v15, %v332_v14  ;;  %v321_v29 = vcvt.s32.f32 %v289_v21  ;;  %v1519_v40 = vmov 32  }
  0x20   : > { %488 = vmatpush.bf16.msra.mxu0 %v1434_v10  ;;  %1453 = vmatpush.bf16.msra.mxu2 %v1434_v10  ;;  %v331_v10 = vcvt.s32.f32 %v299_v2  ;;  %v337_v31 = vcvt.s32.f32 %v305_v23  ;;  %v320_v32 = vcvt.s32.f32 %v288_v24  ;;  %v336_v34 = vcvt.s32.f32 %v304_v26 }
  0x21   : > { %537 = vmatpush.bf16.msra.mxu1 %v1442_v13  ;;  %1461 = vmatpush.bf16.msra.mxu3 %v1442_v13  ;;  %v318_v13 = vcvt.s32.f32 %v286_v5 }
  0x22   : > { %v351_v17 = vpack.c.bf16 %v333_v11, %v331_v10  ;;  %1473 = vset.pattern.permute.xlu0 %v1519_v40  ;;  %1474 = vset.pattern.permute.xlu2 %v1519_v40 }
  0x23   : > { %v344_v18 = vpack.c.bf16 %v318_v13, %v316_v12  ;;  %1475 = vset.pattern.permute.xlu1 %v1519_v40 }
  0x24   : > { %489 = vmatpush.bf16.msra.mxu0 %v1433_v20  ;;  %1454 = vmatpush.bf16.msra.mxu2 %v1433_v20  ;;  %v287_v20 = vunpack.c.2.s8 %v269_v60 }
  0x25   : > { %538 = vmatpush.bf16.msra.mxu1 %v1441_v25  ;;  %1462 = vmatpush.bf16.msra.mxu3 %v1441_v25  ;;  %v290_v25 = vunpack.c.3.s8 %v270_v62 }
  0x26   : > { %v319_v28 = vcvt.s32.f32 %v287_v20 }
  0x27   : > { %v322_v33 = vcvt.s32.f32 %v290_v25 }
  0x28   : > { %490 = vmatpush.bf16.msra.mxu0 %v1432_v30  ;;  %1455 = vmatpush.bf16.msra.mxu2 %v1432_v30  ;;  %v335_v30 = vcvt.s32.f32 %v303_v22 }
  0x29   : > { %539 = vmatpush.bf16.msra.mxu1 %v1440_v35  ;;  %1463 = vmatpush.bf16.msra.mxu3 %v1440_v35  ;;  %v338_v35 = vcvt.s32.f32 %v306_v27 }
  0x2b   : > { %491 = vmatmul.bf16.vlgmr.msra.gmra.mxu0 %v339_v36  ;;  %511 = vmatmul.bf16.vlgmr.msra.gmra.mxu2 %v347_v37  ;;  %v345_v36 = vpack.c.bf16 %v321_v29, %v319_v28  ;;  %v353_v37 = vpack.c.bf16 %v337_v31, %v335_v30 }
  0x2c   : > { %540 = vmatmul.bf16.vlgmr.msra.gmra.mxu1 %v340_v38  ;;  %560 = vmatmul.bf16.vlgmr.msra.gmra.mxu3 %v348_v39  ;;  %v346_v38 = vpack.c.bf16 %v322_v33, %v320_v32  ;;  %v354_v39 = vpack.c.bf16 %v338_v35, %v336_v34 }
  0x3b   : > { %496 = vmatmul.bf16.gmra.mxu0 %v341_v56  ;;  %516 = vmatmul.bf16.gmra.mxu2 %v349_v57 }
  0x3c   : > { %545 = vmatmul.bf16.gmra.mxu1 %v342_v58  ;;  %565 = vmatmul.bf16.gmra.mxu3 %v350_v59 }
  0x4b   : > { %501 = vmatmul.bf16.gmra.mxu0 %v343_v16  ;;  %521 = vmatmul.bf16.gmra.mxu2 %v351_v17 }
  0x4c   : > { %550 = vmatmul.bf16.gmra.mxu1 %v344_v18  ;;  %570 = vmatmul.bf16.gmra.mxu3 %v352_v19 }
  0x5b   : > { %506 = vmatmul.bf16.gmra.mxu0 %v345_v36  ;;  %526 = vmatmul.bf16.gmra.mxu2 %v353_v37 }
  0x5c   : > { %555 = vmatmul.bf16.gmra.mxu1 %v346_v38  ;;  %575 = vmatmul.bf16.gmra.mxu3 %v354_v39 }
  0xa8   : > { %v492_v41 = vpop.f32.mrf.mxu0 }
  0xa9   : > { %v541_v42 = vpop.f32.mrf.mxu1 }
  0xaa   : > { %v1621_v43 = vadd.f32 %v541_v42, %v492_v41 }
  0xac   : > { %v597_v44 = vmax.f32 %v1621_v43, 1.0  ;;  %vm581_vm1 = vcmp.gt.f32.partialorder %v1621_v43, 0.0 }
  0xae   : > { %1479 = vrcp.f32 %v597_v44  ;;  %v512_v45 = vpop.f32.mrf.mxu2  ;;  %v622_v58 = vand.u32 2147483647, %v597_v44  ;;  %v624_v59 = vand.u32 2147483648, %v597_v44  ;;  %vm618_vm2 = vweird.f32 %v597_v44 }
  0xaf   : > { %v561_v46 = vpop.f32.mrf.mxu3 }
  0xb0   : > { %v1624_v47 = vadd.f32 %v561_v46, %v512_v45  ;;  %v494_v48 = vpop.f32.mrf.mxu0  ;;  %vm623_vm3 = vcmp.eq.f32.partialorder %v622_v58, 8.507059e+37  ;;  %v625_v4 = vor.u32 1.1754944e-38, %v624_v59 }
  0xb1   : > { %v543_v49 = vpop.f32.mrf.mxu1 }
  0xb2   : > { %v605_v50 = vmax.f32 %v1624_v47, 1.0  ;;  %v1627_v51 = vadd.f32 %v543_v49, %v494_v48  ;;  %vm589_vm5 = vcmp.gt.f32.partialorder %v1624_v47, 0.0 }
  0xb4   : > { %v1480_v52 = vpop.eup %1479  ;;  %1481 = vrcp.f32 %v605_v50  ;;  %v1630_v53 = vmax.f32 %v1627_v51, 1.0  ;;  %v742_v8 = vand.u32 2147483647, %v605_v50  ;;  %v744_v11 = vand.u32 2147483648, %v605_v50 }
  0xb5   : > { %v614_v54 = vmul.f32 %v1480_v52, %v597_v44  ;;  %vm619_vm0 = vweird.f32 %v1480_v52  ;;  %vm738_vm7 = vweird.f32 %v605_v50  ;;  %vm582_vm9 = vcmp.gt.f32.partialorder %v1627_v51, 0.0 }
  0xb6   : > { %1483 = vrcp.f32 %v1630_v53  ;;  %v514_v55 = vpop.f32.mrf.mxu2  ;;  %vm620_vm4 = vmor %vm618_vm2, %vm619_vm0  ;;  %v637_v15 = vand.u32 2147483647, %v1630_v53  ;;  %v639_v16 = vand.u32 2147483648, %v1630_v53  ;;  %vm1654_vm8 = vcmp.eq.f32.partialorder %v742_v8, 8.507059e+37 }
  0xb7   : > { %v563_v56 = vpop.f32.mrf.mxu3  ;;  %v615_v57 = vsub.f32 1.0, %v614_v54  ;;  %vm633_vm10 = vweird.f32 %v1630_v53  ;;  %v745_v30 = vor.u32 1.1754944e-38, %v744_v11 }
  0xb8   : > { %v1633_v60 = vadd.f32 %v563_v56, %v514_v55  ;;  %v497_v61 = vpop.f32.mrf.mxu0  ;;  %vm1666_vm13 = vcmp.eq.f32.partialorder %v637_v15, 8.507059e+37  ;;  %v640_v34 = vor.u32 1.1754944e-38, %v639_v16 }
  0xb9   : > { %v546_v62 = vpop.f32.mrf.mxu1  ;;  %v616_v63 = vmul.f32 %v1480_v52, %v615_v57 }
  0xba   : > { %v1482_v0 = vpop.eup %1481  ;;  %v1636_v1 = vmax.f32 %v1633_v60, 1.0  ;;  %v1638_v2 = vadd.f32 %v546_v62, %v497_v61  ;;  %vm590_vm15 = vcmp.gt.f32.partialorder %v1633_v60, 0.0 }
  0xbb   : > { %v617_v3 = vadd.f32 %v1480_v52, %v616_v63  ;;  %v734_v5 = vmul.f32 %v1482_v0, %v605_v50  ;;  %vm739_vm6 = vweird.f32 %v1482_v0 }
  0xbc   : > { %v1484_v6 = vpop.eup %1483  ;;  %1485 = vrcp.f32 %v1636_v1  ;;  %v1643_v7 = vmax.f32 %v1638_v2, 1.0  ;;  %vm740_vm12 = vmor %vm738_vm7, %vm739_vm6  ;;  %v757_v39 = vand.u32 2147483647, %v1636_v1  ;;  %v759_v48 = vand.u32 2147483648, %v1636_v1 }
  0xbd   : > { %v621_v9 = vsel %vm620_vm4, %v1480_v52, %v617_v3  ;;  %v735_v10 = vsub.f32 1.0, %v734_v5  ;;  %v629_v12 = vmul.f32 %v1484_v6, %v1630_v53  ;;  %vm634_vm11 = vweird.f32 %v1484_v6 }
  0xbe   : > { %1487 = vrcp.f32 %v1643_v7  ;;  %v517_v13 = vpop.f32.mrf.mxu2  ;;  %v626_v14 = vsel %vm623_vm3, %v625_v4, %v621_v9  ;;  %vm635_vm14 = vmor %vm633_vm10, %vm634_vm11  ;;  %vm1694_vm2 = vcmp.eq.f32.partialorder %v757_v39, 8.507059e+37  ;;  %v654_v57 = vand.u32 2147483648, %v1643_v7 }
  0xbf   : > { %v566_v17 = vpop.f32.mrf.mxu3  ;;  %v853_v18 = vsel %vm581_vm1, %v626_v14, 0.0  ;;  %v736_v19 = vmul.f32 %v1482_v0, %v735_v10  ;;  %v630_v20 = vsub.f32 1.0, %v629_v12  ;;  %vm753_vm1 = vweird.f32 %v1636_v1 }
  0xc0   : > { %v1652_v21 = vadd.f32 %v566_v17, %v517_v13  ;;  %887 = vperm.xlu0 %1473, %v853_v18   ;;  %v499_v22 = vpop.f32.mrf.mxu0  ;;  %v652_v62 = vand.u32 2147483647, %v1643_v7  ;;  %vm648_vm6 = vweird.f32 %v1643_v7  ;;  %v655_v11 = vor.u32 1.1754944e-38, %v654_v57 }
  0xc1   : > { %v548_v24 = vpop.f32.mrf.mxu1  ;;  %v737_v25 = vadd.f32 %v1482_v0, %v736_v19  ;;  %v631_v26 = vmul.f32 %v1484_v6, %v630_v20 }
  0xc2   : > { %v1486_v27 = vpop.eup %1485  ;;  %v1661_v28 = vmax.f32 %v1652_v21, 1.0  ;;  %v1663_v29 = vadd.f32 %v548_v24, %v499_v22 }
  0xc3   : > { %v741_v32 = vsel %vm740_vm12, %v1482_v0, %v737_v25  ;;  %v632_v33 = vadd.f32 %v1484_v6, %v631_v26  ;;  %v749_v35 = vmul.f32 %v1486_v27, %v1636_v1  ;;  %vm754_vm0 = vweird.f32 %v1486_v27 }
  0xc4   : > { %v1488_v36 = vpop.eup %1487  ;;  %1489 = vrcp.f32 %v1661_v28  ;;  %v1673_v37 = vmax.f32 %v1663_v29, 1.0  ;;  %v746_v38 = vsel %vm1654_vm8, %v745_v30, %v741_v32  ;;  %vm755_vm4 = vmor %vm753_vm1, %vm754_vm0  ;;  %v760_v1 = vor.u32 1.1754944e-38, %v759_v48 }
  0xc5   : > { %v861_v40 = vsel %vm589_vm5, %v746_v38, 0.0  ;;  %v636_v41 = vsel %vm635_vm14, %v1484_v6, %v632_v33  ;;  %v750_v42 = vsub.f32 1.0, %v749_v35  ;;  %v644_v44 = vmul.f32 %v1488_v36, %v1643_v7 }
  0xc6   : > { %1491 = vrcp.f32 %v1673_v37  ;;  %927 = vperm.xlu2 %1474, %v861_v40   ;;  %v519_v45 = vpop.f32.mrf.mxu2  ;;  %v641_v46 = vsel %vm1666_vm13, %v640_v34, %v636_v41  ;;  %vm649_vm3 = vweird.f32 %v1488_v36  ;;  %vm583_vm5 = vcmp.gt.f32.partialorder %v1638_v2, 0.0 }
  0xc7   : > { %v568_v49 = vpop.f32.mrf.mxu3  ;;  %v854_v50 = vsel %vm582_vm9, %v641_v46, 0.0  ;;  %v751_v52 = vmul.f32 %v1486_v27, %v750_v42  ;;  %v645_v53 = vsub.f32 1.0, %v644_v44  ;;  %vm650_vm7 = vmor %vm648_vm6, %vm649_vm3  ;;  %vm653_vm8 = vcmp.eq.f32.partialorder %v652_v62, 8.507059e+37 }
  0xc8   : > { %v1691_v54 = vadd.f32 %v568_v49, %v519_v45  ;;  %892 = vperm.xlu0 %1473, %v854_v50   ;;  %v502_v55 = vpop.f32.mrf.mxu0  ;;  %v774_v7 = vand.u32 2147483648, %v1661_v28  ;;  %vm591_vm9 = vcmp.gt.f32.partialorder %v1652_v21, 0.0  ;;  %v772_v16 = vand.u32 2147483647, %v1661_v28 }
  0xc9   : > { %v551_v58 = vpop.f32.mrf.mxu1  ;;  %v752_v59 = vadd.f32 %v1486_v27, %v751_v52  ;;  %v646_v61 = vmul.f32 %v1488_v36, %v645_v53  ;;  %vm768_vm11 = vweird.f32 %v1661_v28  ;;  %vm663_vm12 = vweird.f32 %v1673_v37 }
  0xca   : > { %v1490_v63 = vpop.eup %1489  ;;  %v1701_v0 = vmax.f32 %v1691_v54, 1.0  ;;  %v1703_v3 = vadd.f32 %v551_v58, %v502_v55  ;;  %v775_v30 = vor.u32 1.1754944e-38, %v774_v7  ;;  %v667_v32 = vand.u32 2147483647, %v1673_v37 }
  0xcb   : > { %v756_v4 = vsel %vm755_vm4, %v1486_v27, %v752_v59  ;;  %v647_v5 = vadd.f32 %v1488_v36, %v646_v61  ;;  %v764_v6 = vmul.f32 %v1490_v63, %v1661_v28  ;;  %vm769_vm10 = vweird.f32 %v1490_v63 }
  0xcc   : > { %v1709_v8 = vpop.eup %1491  ;;  %1493 = vrcp.f32 %v1701_v0  ;;  %v1713_v9 = vmax.f32 %v1703_v3, 1.0  ;;  %v761_v10 = vsel %vm1694_vm2, %v760_v1, %v756_v4  ;;  %v787_v31 = vand.u32 2147483647, %v1701_v0  ;;  %vm770_vm13 = vmor %vm768_vm11, %vm769_vm10 }
  0xcd   : > { %v651_v12 = vsel %vm650_vm7, %v1488_v36, %v647_v5  ;;  %v765_v13 = vsub.f32 1.0, %v764_v6  ;;  %v659_v17 = vmul.f32 %v1709_v8, %v1673_v37  ;;  %v862_v19 = vsel %vm590_vm15, %v761_v10, 0.0 }
  0xce   : > { %1495 = vrcp.f32 %v1713_v9  ;;  %v522_v14 = vpop.f32.mrf.mxu2  ;;  %v656_v15 = vsel %vm653_vm8, %v655_v11, %v651_v12  ;;  %v789_v28 = vand.u32 2147483648, %v1701_v0  ;;  %vm773_vm14 = vcmp.eq.f32.partialorder %v772_v16, 8.507059e+37 }
  0xcf   : > { %v571_v18 = vpop.f32.mrf.mxu3  ;;  %v855_v20 = vsel %vm583_vm5, %v656_v15, 0.0  ;;  %v766_v22 = vmul.f32 %v1490_v63, %v765_v13  ;;  %v660_v25 = vsub.f32 1.0, %v659_v17  ;;  %vm664_vm15 = vweird.f32 %v1709_v8 }
  0xd0   : > { %v1728_v23 = vadd.f32 %v571_v18, %v522_v14  ;;  %932 = vperm.xlu0 %1473, %v862_v19   ;;  %897 = vperm.xlu1 %1475, %v855_v20   ;;  %v504_v24 = vpop.f32.mrf.mxu0  ;;  %vm592_vm0 = vcmp.gt.f32.partialorder %v1691_v54, 0.0  ;;  %vm783_vm1 = vweird.f32 %v1701_v0  ;;  %vm1753_vm2 = vcmp.eq.f32.partialorder %v787_v31, 8.507059e+37  ;;  %vm1772_vm6 = vmor %vm663_vm12, %vm664_vm15 }
  0xd1   : > { %v553_v26 = vpop.f32.mrf.mxu1  ;;  %v767_v27 = vadd.f32 %v1490_v63, %v766_v22  ;;  %v661_v36 = vmul.f32 %v1709_v8, %v660_v25  ;;  %v669_v48 = vand.u32 2147483648, %v1673_v37  ;;  %v790_v50 = vor.u32 1.1754944e-38, %v789_v28 }
  0xd2   : > { %v1494_v33 = vpop.eup %1493  ;;  %v1735_v34 = vmax.f32 %v1728_v23, 1.0  ;;  %v1737_v35 = vadd.f32 %v553_v26, %v504_v24  ;;  %vm584_vm3 = vcmp.gt.f32.partialorder %v1663_v29, 0.0  ;;  %vm1760_vm4 = vcmp.eq.f32.partialorder %v667_v32, 8.507059e+37 }
  0xd3   : > { %v771_v38 = vsel %vm770_vm13, %v1490_v63, %v767_v27  ;;  %v779_v39 = vmul.f32 %v1494_v33, %v1701_v0  ;;  %v662_v44 = vadd.f32 %v1709_v8, %v661_v36  ;;  %vm784_vm5 = vweird.f32 %v1494_v33 }
  0xd4   : > { %v1744_v40 = vpop.eup %1495  ;;  %1497 = vrcp.f32 %v1735_v34  ;;  %v1748_v41 = vmax.f32 %v1737_v35, 1.0  ;;  %v776_v42 = vsel %vm773_vm14, %v775_v30, %v771_v38  ;;  %vm678_vm7 = vweird.f32 %v1713_v9 }
  0xd5   : > { %v780_v45 = vsub.f32 1.0, %v779_v39  ;;  %v674_v53 = vmul.f32 %v1744_v40, %v1713_v9  ;;  %v863_v56 = vsel %vm591_vm9, %v776_v42, 0.0  ;;  %v666_v62 = vsel %vm1772_vm6, %v1709_v8, %v662_v44  ;;  %vm785_vm9 = vmor %vm783_vm1, %vm784_vm5 }
  0xd6   : > { %1499 = vrcp.f32 %v1748_v41  ;;  %v524_v49 = vpop.f32.mrf.mxu2  ;;  %vm679_vm8 = vweird.f32 %v1744_v40  ;;  %v670_v37 = vor.u32 1.1754944e-38, %v669_v48  ;;  %v802_v5 = vand.u32 2147483647, %v1735_v34 }
  0xd7   : > { %v573_v55 = vpop.f32.mrf.mxu3  ;;  %v781_v57 = vmul.f32 %v1494_v33, %v780_v45  ;;  %v675_v63 = vsub.f32 1.0, %v674_v53  ;;  %v684_v6 = vand.u32 2147483648, %v1713_v9  ;;  %v682_v13 = vand.u32 2147483647, %v1713_v9  ;;  %vm1804_vm11 = vmor %vm678_vm7, %vm679_vm8 }
  0xd8   : > { %v1777_v59 = vadd.f32 %v573_v55, %v524_v49  ;;  %937 = vperm.xlu1 %1475, %v863_v56   ;;  %v507_v61 = vpop.f32.mrf.mxu0  ;;  %v671_v14 = vsel %vm1760_vm4, %v670_v37, %v666_v62  ;;  %v804_v16 = vand.u32 2147483648, %v1735_v34  ;;  %vm585_vm10 = vcmp.gt.f32.partialorder %v1703_v3, 0.0 }
  0xd9   : > { %v556_v1 = vpop.f32.mrf.mxu1  ;;  %v782_v4 = vadd.f32 %v1494_v33, %v781_v57  ;;  %v676_v8 = vmul.f32 %v1744_v40, %v675_v63  ;;  %vm593_vm12 = vcmp.gt.f32.partialorder %v1728_v23, 0.0  ;;  %v685_v24 = vor.u32 1.1754944e-38, %v684_v6 }
  0xda   : > { %v1498_v10 = vpop.eup %1497  ;;  %v1786_v11 = vmax.f32 %v1777_v59, 1.0  ;;  %v1788_v12 = vadd.f32 %v556_v1, %v507_v61  ;;  %vm798_vm13 = vweird.f32 %v1735_v34  ;;  %vm683_vm14 = vcmp.eq.f32.partialorder %v682_v13, 8.507059e+37 }
  0xdb   : > { %v786_v7 = vsel %vm785_vm9, %v1494_v33, %v782_v4  ;;  %v794_v15 = vmul.f32 %v1498_v10, %v1735_v34  ;;  %v677_v20 = vadd.f32 %v1744_v40, %v676_v8  ;;  %v856_v30 = vsel %vm584_vm3, %v671_v14, 0.0 }
  0xdc   : > { %v1808_v17 = vpop.eup %1499  ;;  %1501 = vrcp.f32 %v1786_v11  ;;  %v1812_v18 = vmax.f32 %v1788_v12, 1.0  ;;  %v791_v19 = vsel %vm1753_vm2, %v790_v50, %v786_v7  ;;  %vm799_vm15 = vweird.f32 %v1498_v10 }
  0xdd   : > { %v864_v22 = vsel %vm592_vm0, %v791_v19, 0.0  ;;  %v795_v9 = vsub.f32 1.0, %v794_v15  ;;  %v681_v26 = vsel %vm1804_vm11, %v1744_v40, %v677_v20  ;;  %v689_v32 = vmul.f32 %v1808_v17, %v1748_v41  ;;  %vm800_vm1 = vmor %vm798_vm13, %vm799_vm15 }
  0xde   : > { %1503 = vrcp.f32 %v1812_v18  ;;  %942 = vperm.xlu2 %1474, %v864_v22   ;;  %v527_v25 = vpop.f32.mrf.mxu2  ;;  %vm1831_vm0 = vcmp.eq.f32.partialorder %v802_v5, 8.507059e+37  ;;  %v805_v38 = vor.u32 1.1754944e-38, %v804_v16  ;;  %v817_v39 = vand.u32 2147483647, %v1786_v11 }
  0xdf   : > { %v576_v27 = vpop.f32.mrf.mxu3  ;;  %v796_v31 = vmul.f32 %v1498_v10, %v795_v9  ;;  %v686_v44 = vsel %vm683_vm14, %v685_v24, %v681_v26  ;;  %v819_v45 = vand.u32 2147483648, %v1786_v11  ;;  %v690_v46 = vsub.f32 1.0, %v689_v32 }
  0xe0   : > { %v1829_v33 = vadd.f32 %v576_v27, %v527_v25  ;;  %902 = vperm.xlu1 %1475, %v856_v30   ;;  %v509_v28 = vpop.f32.mrf.mxu0  ;;  %vm693_vm2 = vweird.f32 %v1748_v41  ;;  %v699_v52 = vand.u32 2147483648, %v1748_v41  ;;  %vm694_vm3 = vweird.f32 %v1808_v17 }
  0xe1   : > { %v558_v40 = vpop.f32.mrf.mxu1  ;;  %v797_v42 = vadd.f32 %v1498_v10, %v796_v31  ;;  %v691_v56 = vmul.f32 %v1808_v17, %v690_v46  ;;  %v857_v61 = vsel %vm585_vm10, %v686_v44, 0.0  ;;  %vm586_vm4 = vcmp.gt.f32.partialorder %v1737_v35, 0.0  ;;  %vm1868_vm6 = vmor %vm693_vm2, %vm694_vm3 }
  0xe2   : > { %v1502_v48 = vpop.eup %1501  ;;  %v1838_v49 = vmax.f32 %v1829_v33, 1.0  ;;  %v1840_v50 = vadd.f32 %v558_v40, %v509_v28  ;;  %v697_v4 = vand.u32 2147483647, %v1748_v41  ;;  %v700_v6 = vor.u32 1.1754944e-38, %v699_v52 }
  0xe3   : > { %v801_v53 = vsel %vm800_vm1, %v1498_v10, %v797_v42  ;;  %v809_v55 = vmul.f32 %v1502_v48, %v1786_v11  ;;  %v692_v1 = vadd.f32 %v1808_v17, %v691_v56  ;;  %vm814_vm5 = vweird.f32 %v1502_v48 }
  0xe4   : > { %v1504_v57 = vpop.eup %1503  ;;  %1505 = vrcp.f32 %v1838_v49  ;;  %v1852_v58 = vmax.f32 %v1840_v50, 1.0  ;;  %v806_v34 = vsel %vm1831_vm0, %v805_v38, %v801_v53  ;;  %vm708_vm7 = vweird.f32 %v1812_v18 }
  0xe5   : > { %v865_v62 = vsel %vm593_vm12, %v806_v34, 0.0  ;;  %v810_v63 = vsub.f32 1.0, %v809_v55  ;;  %v704_v10 = vmul.f32 %v1504_v57, %v1812_v18  ;;  %v696_v7 = vsel %vm1868_vm6, %v1808_v17, %v692_v1 }
  0xe6   : > { %1507 = vrcp.f32 %v1852_v58  ;;  %947 = vperm.xlu0 %1473, %v865_v62   ;;  %907 = vperm.xlu2 %1474, %v857_v61   ;;  %v529_v37 = vpop.f32.mrf.mxu2  ;;  %v714_v14 = vand.u32 2147483648, %v1812_v18  ;;  %vm709_vm8 = vweird.f32 %v1504_v57  ;;  %v712_v16 = vand.u32 2147483647, %v1812_v18 }
  0xe7   : > { %v578_v8 = vpop.f32.mrf.mxu3  ;;  %v811_v13 = vmul.f32 %v1502_v48, %v810_v63  ;;  %v705_v41 = vsub.f32 1.0, %v704_v10  ;;  %vm594_vm9 = vcmp.gt.f32.partialorder %v1777_v59, 0.0  ;;  %vm813_vm10 = vweird.f32 %v1786_v11  ;;  %vm1889_vm14 = vmor %vm708_vm7, %vm709_vm8 }
  0xe8   : > { %v1878_v15 = vadd.f32 %v578_v8, %v529_v37  ;;  %vm698_vm11 = vcmp.eq.f32.partialorder %v697_v4, 8.507059e+37  ;;  %vm815_vm12 = vmor %vm813_vm10, %vm814_vm5  ;;  %v820_v17 = vor.u32 1.1754944e-38, %v819_v45  ;;  %vm818_vm13 = vcmp.eq.f32.partialorder %v817_v39, 8.507059e+37 }
  0xe9   : > { %v812_v0 = vadd.f32 %v1502_v48, %v811_v13  ;;  %v701_v22 = vsel %vm698_vm11, %v700_v6, %v696_v7  ;;  %v706_v9 = vmul.f32 %v1504_v57, %v705_v41  ;;  %v715_v26 = vor.u32 1.1754944e-38, %v714_v14 }
  0xea   : > { %v1506_v19 = vpop.eup %1505  ;;  %v1884_v20 = vmax.f32 %v1878_v15, 1.0  ;;  %vm713_vm15 = vcmp.eq.f32.partialorder %v712_v16, 8.507059e+37  ;;  %v858_v28 = vsel %vm586_vm4, %v701_v22, 0.0  ;;  %v834_v36 = vand.u32 2147483648, %v1838_v49 }
  0xeb   : > { %v816_v24 = vsel %vm815_vm12, %v1502_v48, %v812_v0  ;;  %v824_v11 = vmul.f32 %v1506_v19, %v1838_v49  ;;  %v707_v31 = vadd.f32 %v1504_v57, %v706_v9  ;;  %vm587_vm0 = vcmp.gt.f32.partialorder %v1788_v12, 0.0  ;;  %v1931_v0 = vld [vmem:[%s2181_s3 + $0x2] ss:$0 sm:$0xff] }
  0xec   : > { %v1508_v27 = vpop.eup %1507  ;;  %1509 = vrcp.f32 %v1884_v20  ;;  %v821_v30 = vsel %vm818_vm13, %v820_v17, %v816_v24  ;;  %vm828_vm1 = vweird.f32 %v1838_v49  ;;  %vm829_vm2 = vweird.f32 %v1506_v19 }
  0xed   : > { %v866_v32 = vsel %vm594_vm9, %v821_v30, 0.0  ;;  %v825_v18 = vsub.f32 1.0, %v824_v11  ;;  %v711_v38 = vsel %vm1889_vm14, %v1504_v57, %v707_v31  ;;  %v719_v39 = vmul.f32 %v1508_v27, %v1852_v58  ;;  %vm830_vm3 = vmor %vm828_vm1, %vm829_vm2 }
  0xee   : > { %952 = vperm.xlu1 %1475, %v866_v32   ;;  %912 = vperm.xlu2 %1474, %v858_v28   ;;  %v716_v40 = vsel %vm713_vm15, %v715_v26, %v711_v38  ;;  %v832_v44 = vand.u32 2147483647, %v1838_v49  ;;  %v835_v52 = vor.u32 1.1754944e-38, %v834_v36  ;;  %v729_v53 = vand.u32 2147483648, %v1852_v58  ;;  %v1945_v26 = vld [vmem:[%s2181_s3 + $0x1] ss:$0 sm:$0xff] }
  0xef   : > { %v826_v42 = vmul.f32 %v1506_v19, %v825_v18  ;;  %v859_v45 = vsel %vm587_vm0, %v716_v40, 0.0  ;;  %v720_v46 = vsub.f32 1.0, %v719_v39  ;;  %vm723_vm4 = vweird.f32 %v1852_v58  ;;  %v869_v32 = vld [vmem:[%s1926_s13] sm:$0xff] }
  0xf0   : > { %917 = vperm.xlu0 %1473, %v859_v45   ;;  %vm724_vm5 = vweird.f32 %v1508_v27  ;;  %v727_v57 = vand.u32 2147483647, %v1852_v58  ;;  %vm833_vm6 = vcmp.eq.f32.partialorder %v832_v44, 8.507059e+37  ;;  %vm595_vm7 = vcmp.gt.f32.partialorder %v1829_v33, 0.0 }
  0xf1   : > { %v827_v48 = vadd.f32 %v1506_v19, %v826_v42  ;;  %v721_v56 = vmul.f32 %v1508_v27, %v720_v46  ;;  %vm725_vm8 = vmor %vm723_vm4, %vm724_vm5  ;;  %v730_v1 = vor.u32 1.1754944e-38, %v729_v53  ;;  %vm588_vm9 = vcmp.gt.f32.partialorder %v1840_v50, 0.0  ;;  %v870_v42 = vld [vmem:[%s1926_s13 + $0x8] sm:$0xff] }
  0xf2   : > { %v1510_v55 = vpop.eup %1509  ;;  %vm728_vm10 = vcmp.eq.f32.partialorder %v727_v57, 8.507059e+37  ;;  %v849_v5 = vand.u32 2147483648, %v1884_v20  ;;  %v847_v10 = vand.u32 2147483647, %v1884_v20  ;;  %vm843_vm12 = vweird.f32 %v1884_v20  ;;  %v878_v57 = vld [vmem:[%s1926_s13 + $0x48] sm:$0xff] }
  0xf3   : > { %v831_v34 = vsel %vm830_vm3, %v1506_v19, %v827_v48  ;;  %v839_v61 = vmul.f32 %v1510_v55, %v1884_v20  ;;  %v722_v62 = vadd.f32 %v1508_v27, %v721_v56  ;;  %vm844_vm11 = vweird.f32 %v1510_v55  ;;  %v877_v19 = vld [vmem:[%s1926_s13 + $0x40] sm:$0xff] }
  0xf4   : > { %v836_v49 = vsel %vm833_vm6, %v835_v52, %v831_v34  ;;  %vm845_vm13 = vmor %vm843_vm12, %vm844_vm11  ;;  %v850_v7 = vor.u32 1.1754944e-38, %v849_v5  ;;  %vm848_vm14 = vcmp.eq.f32.partialorder %v847_v10, 8.507059e+37  ;;  %vm596_vm15 = vcmp.gt.f32.partialorder %v1878_v15, 0.0  ;;  %v1937_v20 = vld [vmem:[%s2181_s3] ss:$0 sm:$0xff]  ;;  %v871_v10 = vld [vmem:[%s1926_s13 + $0x10] sm:$0xff] }
  0xf5   : > { %v867_v63 = vsel %vm595_vm7, %v836_v49, 0.0  ;;  %v840_v4 = vsub.f32 1.0, %v839_v61  ;;  %v726_v37 = vsel %vm725_vm8, %v1508_v27, %v722_v62  ;;  %v1108_v9 = vmul.f32 %v1931_v0, %v877_v19 }
  0xf6   : > { %957 = vperm.xlu2 %1474, %v867_v63   ;;  %v731_v58 = vsel %vm728_vm10, %v730_v1, %v726_v37  ;;  %vm1033_vm0 = vcmask 261120   ;;  %v1100_v36 = vmul.f32 %v1931_v0, %v869_v32  ;;  %v1101_v52 = vmul.f32 %v1931_v0, %v870_v42 }
  0xf7   : > { %v841_v6 = vmul.f32 %v1510_v55, %v840_v4  ;;  %v860_v8 = vsel %vm588_vm9, %v731_v58, 0.0  ;;  %v1109_v1 = vmul.f32 %v1931_v0, %v878_v57  ;;  %vm1232_vm1 = vcmask 7168  }
  0xf8   : > { %922 = vperm.xlu1 %1475, %v860_v8   ;;  %vm1215_vm3 = vcmask 11264  }
  0xf9   : > { %v842_v13 = vadd.f32 %v1510_v55, %v841_v6 }
  0xfb   : > { %v846_v14 = vsel %vm845_vm13, %v1510_v55, %v842_v13 }
  0xfc   : > { %v851_v41 = vsel %vm848_vm14, %v850_v7, %v846_v14  ;;  %v879_v7 = vld [vmem:[%s1926_s13 + $0x50] sm:$0xff] }
  0xfd   : > { %v868_v16 = vsel %vm596_vm15, %v851_v41, 0.0 }
  0xfe   : > { %962 = vperm.xlu0 %1473, %v868_v16  }
 0x120   : > { %v928_v17 = vpop.permute.xlu2 %927 }
 0x121   : > { %v973_v22 = vmul.f32 %v928_v17, %v1624_v47 }
 0x123   : > { %v989_v24 = vsub.f32 %v877_v19, %v973_v22  ;;  %v1091_v25 = vmul.f32 %v1937_v20, %v973_v22  ;;  %v1102_v19 = vmul.f32 %v1931_v0, %v871_v10 }
 0x125   : > { %v1008_v11 = vmul.f32 %v989_v24, %v989_v24  ;;  %v1124_v27 = vadd.f32 %v1108_v9, %v1091_v25  ;;  %v1110_v9 = vmul.f32 %v1931_v0, %v879_v7 }
 0x127   : > { %v1156_v30 = vsel %vm1033_vm0, %v1124_v27, 0.0  ;;  %v1025_v31 = vmul.f32 %v1945_v26, %v1008_v11 }
 0x128   : > { %1157 = vadd.xlane.f32.xlu0 %v1156_v30 }
 0x129   : > { %v1058_v47 = vsel %vm1033_vm0, %v1025_v31, 0.0 }
 0x12a   : > { %1059 = vadd.xlane.f32.xlu2 %v1058_v47 }
 0x132   : > { %v888_v28 = vpop.permute.xlu0 %887 }
 0x133   : > { %v965_v18 = vmul.f32 %v888_v28, %v1621_v43 }
 0x135   : > { %v981_v38 = vsub.f32 %v869_v32, %v965_v18  ;;  %v1083_v39 = vmul.f32 %v1937_v20, %v965_v18  ;;  %v872_v32 = vld [vmem:[%s1926_s13 + $0x18] sm:$0xff] }
 0x137   : > { %v1116_v40 = vadd.f32 %v1100_v36, %v1083_v39  ;;  %v1000_v44 = vmul.f32 %v981_v38, %v981_v38 }
 0x138   : > { %v943_v58 = vpop.permute.xlu2 %942 }
 0x139   : > { %v1132_v45 = vsel %vm1033_vm0, %v1116_v40, 0.0  ;;  %v1017_v55 = vmul.f32 %v1945_v26, %v1000_v44  ;;  %v976_v18 = vmul.f32 %v943_v58, %v1691_v54  ;;  %v880_v44 = vld [vmem:[%s1926_s13 + $0x58] sm:$0xff] }
 0x13a   : > { %v893_v46 = vpop.permute.xlu0 %892  ;;  %1133 = vadd.xlane.f32.xlu1 %v1132_v45 }
 0x13b   : > { %v966_v48 = vmul.f32 %v893_v46, %v1627_v51  ;;  %v1034_v49 = vsel %vm1033_vm0, %v1017_v55, 0.0  ;;  %v1103_v46 = vmul.f32 %v1931_v0, %v872_v32 }
 0x13d   : > { %v982_v53 = vsub.f32 %v870_v42, %v966_v48  ;;  %v1084_v43 = vmul.f32 %v1937_v20, %v966_v48  ;;  %v873_v48 = vld [vmem:[%s1926_s13 + $0x20] sm:$0xff] }
 0x13f   : > { %v1117_v56 = vadd.f32 %v1101_v52, %v1084_v43  ;;  %v1001_v34 = vmul.f32 %v982_v53, %v982_v53  ;;  %v992_v53 = vsub.f32 %v880_v44, %v976_v18 }
 0x140   : > { %v908_v47 = vpop.permute.xlu2 %907 }
 0x141   : > { %v1135_v61 = vsel %vm1033_vm0, %v1117_v56, 0.0  ;;  %v1018_v5 = vmul.f32 %v1945_v26, %v1001_v34  ;;  %v969_v45 = vmul.f32 %v908_v47, %v1703_v3  ;;  %v1094_v3 = vmul.f32 %v1937_v20, %v976_v18 }
 0x142   : > { %v933_v62 = vpop.permute.xlu0 %932  ;;  %v898_v63 = vpop.permute.xlu1 %897  ;;  %1136 = vadd.xlane.f32.xlu2 %v1135_v61  ;;  %1035 = vadd.xlane.f32.xlu1 %v1034_v49  ;;  %v1111_v61 = vmul.f32 %v1931_v0, %v880_v44  ;;  %v1011_v49 = vmul.f32 %v992_v53, %v992_v53 }
 0x143   : > { %v974_v51 = vmul.f32 %v933_v62, %v1633_v60  ;;  %v967_v8 = vmul.f32 %v898_v63, %v1638_v2  ;;  %v1037_v14 = vsel %vm1033_vm0, %v1018_v5, 0.0  ;;  %v985_v55 = vsub.f32 %v873_v48, %v969_v45 }
 0x145   : > { %v990_v4 = vsub.f32 %v878_v57, %v974_v51  ;;  %v1092_v37 = vmul.f32 %v1937_v20, %v974_v51  ;;  %v1085_v17 = vmul.f32 %v1937_v20, %v967_v8  ;;  %v983_v11 = vsub.f32 %v871_v10, %v967_v8 }
 0x146   : > { %v1127_v10 = vadd.f32 %v1111_v61, %v1094_v3  ;;  %v884_v3 = vld [vmem:[%s1926_s13 + $0x78] sm:$0xff] }
 0x147   : > { %v1009_v6 = vmul.f32 %v990_v4, %v990_v4  ;;  %v1125_v13 = vadd.f32 %v1109_v1, %v1092_v37  ;;  %v1118_v31 = vadd.f32 %v1102_v19, %v1085_v17  ;;  %v1002_v38 = vmul.f32 %v983_v11, %v983_v11  ;;  %v881_v4 = vld [vmem:[%s1926_s13 + $0x60] sm:$0xff]  ;;  %v874_v19 = vld [vmem:[%s1926_s13 + $0x28] sm:$0xff] }
 0x148   : > { %v1004_v1 = vmul.f32 %v985_v55, %v985_v55  ;;  %v913_v5 = vpop.permute.xlu2 %912 }
 0x149   : > { %v1159_v41 = vsel %vm1033_vm0, %v1125_v13, 0.0  ;;  %v1026_v60 = vmul.f32 %v1945_v26, %v1009_v6  ;;  %v1138_v40 = vsel %vm1033_vm0, %v1118_v31, 0.0  ;;  %v1028_v6 = vmul.f32 %v1945_v26, %v1011_v49 }
 0x14a   : > { %v938_v16 = vpop.permute.xlu1 %937  ;;  %1038 = vadd.xlane.f32.xlu2 %v1037_v14  ;;  %1160 = vadd.xlane.f32.xlu1 %v1159_v41  ;;  %v1087_v13 = vmul.f32 %v1937_v20, %v969_v45  ;;  %v970_v14 = vmul.f32 %v913_v5, %v1737_v35 }
 0x14b   : > { %v975_v22 = vmul.f32 %v938_v16, %v1652_v21  ;;  %v1061_v2 = vsel %vm1033_vm0, %v1026_v60, 0.0  ;;  %v1067_v60 = vsel %vm1033_vm0, %v1028_v6, 0.0  ;;  %v1165_v16 = vsel %vm1033_vm0, %v1127_v10, 0.0 }
 0x14c   : > { %1062 = vadd.xlane.f32.xlu0 %v1061_v2  ;;  %v1088_v47 = vmul.f32 %v1937_v20, %v970_v14 }
 0x14d   : > { %v991_v24 = vsub.f32 %v879_v7, %v975_v22  ;;  %v1093_v25 = vmul.f32 %v1937_v20, %v975_v22  ;;  %v1104_v7 = vmul.f32 %v1931_v0, %v873_v48 }
 0x14f   : > { %v1010_v27 = vmul.f32 %v991_v24, %v991_v24  ;;  %v1126_v30 = vadd.f32 %v1110_v9, %v1093_v25  ;;  %v1112_v9 = vmul.f32 %v1931_v0, %v881_v4  ;;  %v2015_v24 = vld [vmem:[%s1926_s13 + $0x68] sm:$0xff]  ;;  %v1120_v35 = vadd.f32 %v1104_v7, %v1087_v13 }
 0x150   : > { %v986_v25 = vsub.f32 %v874_v19, %v970_v14 }
 0x151   : > { %v1162_v28 = vsel %vm1033_vm0, %v1126_v30, 0.0  ;;  %v1027_v21 = vmul.f32 %v1945_v26, %v1010_v27  ;;  %v958_v27 = vpop.permute.xlu2 %957 }
 0x152   : > { %v903_v36 = vpop.permute.xlu1 %902  ;;  %1163 = vadd.xlane.f32.xlu2 %v1162_v28  ;;  %v1105_v28 = vmul.f32 %v1931_v0, %v874_v19  ;;  %v979_v18 = vmul.f32 %v958_v27, %v1829_v33  ;;  %v1180_v27 = vlaneseq }
 0x153   : > { %v968_v39 = vmul.f32 %v903_v36, %v1663_v29  ;;  %v1064_v42 = vsel %vm1033_vm0, %v1027_v21, 0.0  ;;  %v1019_v29 = vmul.f32 %v1945_v26, %v1002_v38  ;;  %v1005_v21 = vmul.f32 %v986_v25, %v986_v25 }
 0x154   : > { %1139 = vadd.xlane.f32.xlu0 %v1138_v40  ;;  %1065 = vadd.xlane.f32.xlu1 %v1064_v42  ;;  %v875_v42 = vld [vmem:[%s1926_s13 + $0x30] sm:$0xff]  ;;  %v1121_v45 = vadd.f32 %v1105_v28, %v1088_v47 }
 0x155   : > { %v984_v52 = vsub.f32 %v872_v32, %v968_v39  ;;  %v1086_v54 = vmul.f32 %v1937_v20, %v968_v39  ;;  %v1040_v51 = vsel %vm1033_vm0, %v1019_v29, 0.0  ;;  %v1144_v32 = vsel %vm1033_vm0, %v1120_v35, 0.0  ;;  %v883_v39 = vld [vmem:[%s1926_s13 + $0x70] sm:$0xff] }
 0x156   : > { %v1147_v53 = vsel %vm1033_vm0, %v1121_v45, 0.0  ;;  %v1106_v49 = vmul.f32 %v1931_v0, %v875_v42  ;;  %v1114_v14 = vmul.f32 %v1931_v0, %v883_v39 }
 0x157   : > { %v1003_v43 = vmul.f32 %v984_v52, %v984_v52  ;;  %v1119_v57 = vadd.f32 %v1103_v46, %v1086_v54  ;;  %v995_v46 = vsub.f32 %v883_v39, %v979_v18  ;;  %v1022_v52 = vmul.f32 %v1945_v26, %v1005_v21 }
 0x158   : > { %v948_v56 = vpop.permute.xlu0 %947 }
 0x159   : > { %v1020_v34 = vmul.f32 %v1945_v26, %v1003_v43  ;;  %v977_v62 = vmul.f32 %v948_v56, %v1728_v23  ;;  %v1141_v37 = vsel %vm1033_vm0, %v1119_v57, 0.0  ;;  %v1021_v23 = vmul.f32 %v1945_v26, %v1004_v1 }
 0x15a   : > { %v1014_v43 = vmul.f32 %v995_v46, %v995_v46  ;;  %v1049_v56 = vsel %vm1033_vm0, %v1022_v52, 0.0 }
 0x15b   : > { %v1043_v63 = vsel %vm1033_vm0, %v1020_v34, 0.0  ;;  %v993_v58 = vsub.f32 %v881_v4, %v977_v62  ;;  %v1095_v17 = vmul.f32 %v1937_v20, %v977_v62  ;;  %v1046_v2 = vsel %vm1033_vm0, %v1021_v23, 0.0  ;;  %v876_v62 = vld [vmem:[%s1926_s13 + $0x38] sm:$0xff] }
 0x15c   : > { %1044 = vadd.xlane.f32.xlu2 %v1043_v63  ;;  %1041 = vadd.xlane.f32.xlu0 %v1040_v51  ;;  %v1031_v51 = vmul.f32 %v1945_v26, %v1014_v43 }
 0x15d   : > { %1142 = vadd.xlane.f32.xlu1 %v1141_v37  ;;  %v1012_v41 = vmul.f32 %v993_v58, %v993_v58  ;;  %v1128_v31 = vadd.f32 %v1112_v9, %v1095_v17  ;;  %v1107_v37 = vmul.f32 %v1931_v0, %v876_v62  ;;  %v1115_v9 = vmul.f32 %v1931_v0, %v884_v3 }
 0x15e   : > { %v1076_v58 = vsel %vm1033_vm0, %v1031_v51, 0.0 }
 0x15f   : > { %v1029_v11 = vmul.f32 %v1945_v26, %v1012_v41  ;;  %v1168_v44 = vsel %vm1033_vm0, %v1128_v31, 0.0  ;;  %v1113_v41 = vmul.f32 %v1931_v0, %v2015_v24 }
 0x160   : > { %v953_v8 = vpop.permute.xlu1 %952 }
 0x161   : > { %v2010_v22 = vmul.f32 %v953_v8, %v1777_v59  ;;  %v1070_v38 = vsel %vm1033_vm0, %v1029_v11, 0.0 }
 0x162   : > { %v918_v30 = vpop.permute.xlu0 %917 }
 0x163   : > { %v994_v59 = vsub.f32 %v2015_v24, %v2010_v22  ;;  %v971_v36 = vmul.f32 %v918_v30, %v1788_v12 }
 0x164   : > { %1068 = vadd.xlane.f32.xlu2 %v1067_v60  ;;  %1166 = vadd.xlane.f32.xlu0 %v1165_v16  ;;  %v1097_v60 = vmul.f32 %v1937_v20, %v979_v18  ;;  %v1096_v16 = vmul.f32 %v1937_v20, %v2010_v22 }
 0x165   : > { %1047 = vadd.xlane.f32.xlu1 %v1046_v2  ;;  %v1013_v40 = vmul.f32 %v994_v59, %v994_v59  ;;  %v987_v48 = vsub.f32 %v875_v42, %v971_v36  ;;  %v1089_v57 = vmul.f32 %v1937_v20, %v971_v36  ;;  %v2063_v59 = vand.u32 127, %v1180_v27 }
 0x166   : > { %v1130_v24 = vadd.f32 %v1114_v14, %v1097_v60  ;;  %v1129_v35 = vadd.f32 %v1113_v41, %v1096_v16 }
 0x167   : > { %v1030_v12 = vmul.f32 %v1945_v26, %v1013_v40  ;;  %v1006_v29 = vmul.f32 %v987_v48, %v987_v48  ;;  %v1122_v4 = vadd.f32 %v1106_v49, %v1089_v57  ;;  %vm1182_vm2 = vcmp.eq.s32.totalorder %v2063_v59, 0 }
 0x168   : > { %v1174_v22 = vsel %vm1033_vm0, %v1130_v24, 0.0  ;;  %v1171_v11 = vsel %vm1033_vm0, %v1129_v35, 0.0 }
 0x169   : > { %v1073_v61 = vsel %vm1033_vm0, %v1030_v12, 0.0  ;;  %v1150_v23 = vsel %vm1033_vm0, %v1122_v4, 0.0 }
 0x16a   : > { %v923_v54 = vpop.permute.xlu1 %922 }
 0x16b   : > { %v972_v34 = vmul.f32 %v923_v54, %v1840_v50 }
 0x16c   : > { %1145 = vadd.xlane.f32.xlu2 %v1144_v32  ;;  %1071 = vadd.xlane.f32.xlu0 %v1070_v38 }
 0x16d   : > { %1169 = vadd.xlane.f32.xlu1 %v1168_v44  ;;  %v988_v1 = vsub.f32 %v876_v62, %v972_v34  ;;  %v1090_v50 = vmul.f32 %v1937_v20, %v972_v34 }
 0x16f   : > { %v1007_v10 = vmul.f32 %v988_v1, %v988_v1  ;;  %v1123_v13 = vadd.f32 %v1107_v37, %v1090_v50 }
 0x170   : > { %v963_v33 = vpop.permute.xlu0 %962 }
 0x171   : > { %v980_v55 = vmul.f32 %v963_v33, %v1878_v15  ;;  %v1023_v15 = vmul.f32 %v1945_v26, %v1006_v29  ;;  %v1024_v7 = vmul.f32 %v1945_v26, %v1007_v10  ;;  %v1153_v17 = vsel %vm1033_vm0, %v1123_v13, 0.0 }
 0x173   : > { %v996_v63 = vsub.f32 %v884_v3, %v980_v55  ;;  %v1052_v6 = vsel %vm1033_vm0, %v1023_v15, 0.0  ;;  %v1098_v2 = vmul.f32 %v1937_v20, %v980_v55 }
 0x174   : > { %1050 = vadd.xlane.f32.xlu2 %v1049_v56  ;;  %1148 = vadd.xlane.f32.xlu0 %v1147_v53 }
 0x175   : > { %1074 = vadd.xlane.f32.xlu1 %v1073_v61  ;;  %v1015_v5 = vmul.f32 %v996_v63, %v996_v63  ;;  %v1131_v25 = vadd.f32 %v1115_v9, %v1098_v2 }
 0x177   : > { %v1032_v8 = vmul.f32 %v1945_v26, %v1015_v5  ;;  %v1055_v26 = vsel %vm1033_vm0, %v1024_v7, 0.0  ;;  %v1177_v20 = vsel %vm1033_vm0, %v1131_v25, 0.0 }
 0x179   : > { %v1079_v19 = vsel %vm1033_vm0, %v1032_v8, 0.0 }
 0x17c   : > { %1077 = vadd.xlane.f32.xlu2 %v1076_v58  ;;  %1053 = vadd.xlane.f32.xlu0 %v1052_v6 }
 0x17d   : > { %1151 = vadd.xlane.f32.xlu1 %v1150_v23 }
 0x184   : > { %1080 = vadd.xlane.f32.xlu0 %v1079_v19  ;;  %1154 = vadd.xlane.f32.xlu2 %v1153_v17 }
 0x185   : > { %1056 = vadd.xlane.f32.xlu1 %v1055_v26 }
 0x18c   : > { %1175 = vadd.xlane.f32.xlu0 %v1174_v22  ;;  %1172 = vadd.xlane.f32.xlu2 %v1171_v11 }
 0x18d   : > { %1178 = vadd.xlane.f32.xlu1 %v1177_v20 }
 0x19b   : > { %v1158_v0 = vpop.xlane.xlu0 %1157 }
 0x19c   : > { %1241 = vst.msk [vmem:[%s2070_s23 + $0x40] sm:$0xff] %vm1232_vm1, %v1158_v0 }
 0x19d   : > { %v1060_v30 = vpop.xlane.xlu2 %1059 }
 0x19e   : > { %v1191_v31 = vsel %vm1182_vm2, %v1060_v30, 1.0 }
 0x19f   : > { %v1207_v47 = vpack.c.bf16 %v1191_v31, %v1191_v31 }
 0x1a1   : > { %1224 = vst.msk [vmem:[%s2079_s27 + $0x20] sm:$0xf] %vm1215_vm3, %v1207_v47 }
 0x1ad   : > { %v1134_v32 = vpop.xlane.xlu1 %1133 }
 0x1ae   : > { %1233 = vst.msk [vmem:[%s2070_s23] sm:$0xff] %vm1232_vm1, %v1134_v32 }
 0x1b5   : > { %v1137_v28 = vpop.xlane.xlu2 %1136  ;;  %v1036_v21 = vpop.xlane.xlu1 %1035 }
 0x1b6   : > { %1234 = vst.msk [vmem:[%s2070_s23 + $0x8] sm:$0xff] %vm1232_vm1, %v1137_v28  ;;  %v1183_v18 = vsel %vm1182_vm2, %v1036_v21, 1.0 }
 0x1b7   : > { %v1199_v36 = vpack.c.bf16 %v1183_v18, %v1183_v18 }
 0x1b9   : > { %1216 = vst.msk [vmem:[%s2079_s27] sm:$0xf] %vm1215_vm3, %v1199_v36 }
 0x1bd   : > { %v1039_v38 = vpop.xlane.xlu2 %1038  ;;  %v1161_v39 = vpop.xlane.xlu1 %1160 }
 0x1be   : > { %v1184_v40 = vsel %vm1182_vm2, %v1039_v38, 1.0  ;;  %1242 = vst.msk [vmem:[%s2070_s23 + $0x48] sm:$0xff] %vm1232_vm1, %v1161_v39 }
 0x1bf   : > { %v1200_v42 = vpack.c.bf16 %v1184_v40, %v1184_v40  ;;  %v1063_v44 = vpop.xlane.xlu0 %1062 }
 0x1c0   : > { %v1192_v45 = vsel %vm1182_vm2, %v1063_v44, 1.0 }
 0x1c1   : > { %1217 = vst.msk [vmem:[%s2079_s27 + $0x4] sm:$0xf] %vm1215_vm3, %v1200_v42  ;;  %v1208_v46 = vpack.c.bf16 %v1192_v45, %v1192_v45 }
 0x1c3   : > { %1225 = vst.msk [vmem:[%s2079_s27 + $0x24] sm:$0xf] %vm1215_vm3, %v1208_v46 }
 0x1c5   : > { %v1164_v48 = vpop.xlane.xlu2 %1163 }
 0x1c6   : > { %1243 = vst.msk [vmem:[%s2070_s23 + $0x50] sm:$0xff] %vm1232_vm1, %v1164_v48 }
 0x1c7   : > { %v1140_v52 = vpop.xlane.xlu0 %1139  ;;  %v1066_v33 = vpop.xlane.xlu1 %1065 }
 0x1c8   : > { %1235 = vst.msk [vmem:[%s2070_s23 + $0x10] sm:$0xff] %vm1232_vm1, %v1140_v52  ;;  %v1193_v12 = vsel %vm1182_vm2, %v1066_v33, 1.0 }
 0x1c9   : > { %v1209_v54 = vpack.c.bf16 %v1193_v12, %v1193_v12 }
 0x1cb   : > { %1226 = vst.msk [vmem:[%s2079_s27 + $0x28] sm:$0xf] %vm1215_vm3, %v1209_v54 }
 0x1cf   : > { %v1045_v53 = vpop.xlane.xlu2 %1044  ;;  %v1042_v43 = vpop.xlane.xlu0 %1041 }
 0x1d0   : > { %v1186_v29 = vsel %vm1182_vm2, %v1045_v53, 1.0  ;;  %v1185_v55 = vsel %vm1182_vm2, %v1042_v43, 1.0  ;;  %v1143_v56 = vpop.xlane.xlu1 %1142 }
 0x1d1   : > { %v1202_v57 = vpack.c.bf16 %v1186_v29, %v1186_v29  ;;  %v1201_v34 = vpack.c.bf16 %v1185_v55, %v1185_v55  ;;  %1236 = vst.msk [vmem:[%s2070_s23 + $0x18] sm:$0xff] %vm1232_vm1, %v1143_v56 }
 0x1d3   : > { %1219 = vst.msk [vmem:[%s2079_s27 + $0xc] sm:$0xf] %vm1215_vm3, %v1202_v57 }
 0x1d4   : > { %1218 = vst.msk [vmem:[%s2079_s27 + $0x8] sm:$0xf] %vm1215_vm3, %v1201_v34 }
 0x1d7   : > { %v1069_v3 = vpop.xlane.xlu2 %1068  ;;  %v1167_v61 = vpop.xlane.xlu0 %1166 }
 0x1d8   : > { %v1194_v49 = vsel %vm1182_vm2, %v1069_v3, 1.0  ;;  %1244 = vst.msk [vmem:[%s2070_s23 + $0x58] sm:$0xff] %vm1232_vm1, %v1167_v61  ;;  %v1048_v62 = vpop.xlane.xlu1 %1047 }
 0x1d9   : > { %v1210_v63 = vpack.c.bf16 %v1194_v49, %v1194_v49  ;;  %v1187_v51 = vsel %vm1182_vm2, %v1048_v62, 1.0 }
 0x1da   : > { %v1203_v15 = vpack.c.bf16 %v1187_v51, %v1187_v51 }
 0x1db   : > { %1227 = vst.msk [vmem:[%s2079_s27 + $0x2c] sm:$0xf] %vm1215_vm3, %v1210_v63 }
 0x1dc   : > { %1220 = vst.msk [vmem:[%s2079_s27 + $0x10] sm:$0xf] %vm1215_vm3, %v1203_v15 }
 0x1df   : > { %v1146_v1 = vpop.xlane.xlu2 %1145  ;;  %v1072_v4 = vpop.xlane.xlu0 %1071 }
 0x1e0   : > { %1237 = vst.msk [vmem:[%s2070_s23 + $0x20] sm:$0xff] %vm1232_vm1, %v1146_v1  ;;  %v1195_v37 = vsel %vm1182_vm2, %v1072_v4, 1.0  ;;  %v1170_v50 = vpop.xlane.xlu1 %1169 }
 0x1e1   : > { %v1211_v5 = vpack.c.bf16 %v1195_v37, %v1195_v37  ;;  %1245 = vst.msk [vmem:[%s2070_s23 + $0x60] sm:$0xff] %vm1232_vm1, %v1170_v50 }
 0x1e3   : > { %1228 = vst.msk [vmem:[%s2079_s27 + $0x30] sm:$0xf] %vm1215_vm3, %v1211_v5 }
 0x1e7   : > { %v1051_v58 = vpop.xlane.xlu2 %1050  ;;  %v1149_v6 = vpop.xlane.xlu0 %1148 }
 0x1e8   : > { %v1188_v10 = vsel %vm1182_vm2, %v1051_v58, 1.0  ;;  %1238 = vst.msk [vmem:[%s2070_s23 + $0x28] sm:$0xff] %vm1232_vm1, %v1149_v6  ;;  %v1075_v23 = vpop.xlane.xlu1 %1074 }
 0x1e9   : > { %v1204_v8 = vpack.c.bf16 %v1188_v10, %v1188_v10  ;;  %v1196_v13 = vsel %vm1182_vm2, %v1075_v23, 1.0 }
 0x1ea   : > { %v1212_v7 = vpack.c.bf16 %v1196_v13, %v1196_v13 }
 0x1eb   : > { %1221 = vst.msk [vmem:[%s2079_s27 + $0x14] sm:$0xf] %vm1215_vm3, %v1204_v8 }
 0x1ec   : > { %1229 = vst.msk [vmem:[%s2079_s27 + $0x34] sm:$0xf] %vm1215_vm3, %v1212_v7 }
 0x1ef   : > { %v1078_v14 = vpop.xlane.xlu2 %1077  ;;  %v1054_v41 = vpop.xlane.xlu0 %1053 }
 0x1f0   : > { %v1197_v60 = vsel %vm1182_vm2, %v1078_v14, 1.0  ;;  %v1189_v16 = vsel %vm1182_vm2, %v1054_v41, 1.0  ;;  %v1152_v19 = vpop.xlane.xlu1 %1151 }
 0x1f1   : > { %v1213_v17 = vpack.c.bf16 %v1197_v60, %v1197_v60  ;;  %v1205_v2 = vpack.c.bf16 %v1189_v16, %v1189_v16  ;;  %1239 = vst.msk [vmem:[%s2070_s23 + $0x30] sm:$0xff] %vm1232_vm1, %v1152_v19 }
 0x1f3   : > { %1230 = vst.msk [vmem:[%s2079_s27 + $0x38] sm:$0xf] %vm1215_vm3, %v1213_v17 }
 0x1f4   : > { %1222 = vst.msk [vmem:[%s2079_s27 + $0x18] sm:$0xf] %vm1215_vm3, %v1205_v2 }
 0x1f7   : > { %v1081_v26 = vpop.xlane.xlu0 %1080  ;;  %v1155_v9 = vpop.xlane.xlu2 %1154 }
 0x1f8   : > { %v1198_v24 = vsel %vm1182_vm2, %v1081_v26, 1.0  ;;  %1240 = vst.msk [vmem:[%s2070_s23 + $0x38] sm:$0xff] %vm1232_vm1, %v1155_v9  ;;  %v1057_v35 = vpop.xlane.xlu1 %1056 }
 0x1f9   : > { %v1214_v25 = vpack.c.bf16 %v1198_v24, %v1198_v24  ;;  %v1190_v22 = vsel %vm1182_vm2, %v1057_v35, 1.0 }
 0x1fa   : > { %v1206_v11 = vpack.c.bf16 %v1190_v22, %v1190_v22 }
 0x1fb   : > { %1231 = vst.msk [vmem:[%s2079_s27 + $0x3c] sm:$0xf] %vm1215_vm3, %v1214_v25 }
 0x1fc   : > { %1223 = vst.msk [vmem:[%s2079_s27 + $0x1c] sm:$0xf] %vm1215_vm3, %v1206_v11 }
 0x1ff   : > { %v1176_v20 = vpop.xlane.xlu0 %1175  ;;  %v1173_v27 = vpop.xlane.xlu2 %1172 }
 0x200   : > { %1247 = vst.msk [vmem:[%s2070_s23 + $0x70] sm:$0xff] %vm1232_vm1, %v1176_v20  ;;  %v1179_v0 = vpop.xlane.xlu1 %1178 }
 0x201   : > { %1246 = vst.msk [vmem:[%s2070_s23 + $0x68] sm:$0xff] %vm1232_vm1, %v1173_v27 }
 0x202   : > { %1248 = vst.msk [vmem:[%s2070_s23 + $0x78] sm:$0xff] %vm1232_vm1, %v1179_v0 }
 0x203 PF: > { %s16_s18 = sadd.s32 1, %s1517_s18  }
 0x204   : > { %p13_p5 = scmp.ge.s32.totalorder %s16_s18, 4  }
 0x206   :  { %15 = sbr.rel (!%p13_p5) target bundleno = 1 (0x1), region = 81 }

</bundles_post_ra>
